<compile_context>
chip_gen: v7x
topology: tpu7x:2x2x1
jax: 0.10.0
libtpu: 0.0.40
codegen_flags: <defaults>
</compile_context>

<pallas_src>
import functools

import jax
import jax.numpy as jnp
from jax.experimental import pallas as pl
from jax.experimental.pallas import tpu as pltpu


def _largest_divisor_leq(n, target):
    target = max(1, min(n, target))
    for d in range(target, 0, -1):
        if n % d == 0:
            return d
    return 1


def conv_stats_kernel(x_ref, w_ref, y_ref, stats_ref, *, th, w_out, cin, cout_p):
    """3x3 'same' conv for one (batch, row-block) tile + one-pass BN partials.

    x_ref:     (1, H+2, W+2, Cin)  spatially padded NHWC input (bf16)
    w_ref:     (9, Cin, Cout_p)    weights, k = kh*3 + kw (bf16)
    y_ref:     (1, TH, W, Cout_p)  raw conv output tile (f32)
    stats_ref: (1, 1, 2, Cout_p)   row 0 = sum(y), row 1 = sum(y*y) over tile
    """
    hb = pl.program_id(1)
    row0 = hb * th                      # first output row of this tile
    acc = None
    for kh in range(3):
        for kw in range(3):
            # shifted input slab for this filter tap (padded coords = out + k)
            slab = x_ref[0, pl.ds(row0 + kh, th), pl.ds(kw, w_out), :]
            lhs = slab.reshape(th * w_out, cin)
            d = jnp.dot(lhs, w_ref[kh * 3 + kw],
                        preferred_element_type=jnp.float32)
            acc = d if acc is None else acc + d
    y_ref[0] = acc.reshape(th, w_out, cout_p)
    # one-pass BN statistics (E[y], E[y^2] partials), accumulated in f32
    stats_ref[0, 0, 0:1, :] = jnp.sum(acc, axis=0, keepdims=True)
    stats_ref[0, 0, 1:2, :] = jnp.sum(acc * acc, axis=0, keepdims=True)


def bn_relu_pool_kernel(p00_ref, p01_ref, p10_ref, p11_ref, scale_ref, shift_ref,
                        out_ref, idx_ref, *, toh, in_w):
    """Fused BN-normalize + ReLU + 2x2/stride-2 max pool with PyTorch indices.

    p{dh}{dw}_ref: (1, TOH, W/2, Cout_p) phase view y[:, dh::2, dw::2, :]
    out/idx:       (1, TOH, W/2, Cout_p) pooled values / flat h*W + w indices
    """
    ob = pl.program_id(1)
    sc = scale_ref[...]                 # (1, Cout_p) -> broadcasts over channels
    sh = shift_ref[...]
    shape = out_ref.shape
    oh = jax.lax.broadcasted_iota(jnp.int32, shape, 1) + ob * toh
    ow = jax.lax.broadcasted_iota(jnp.int32, shape, 2)

    def act(ref):
        return jnp.maximum(ref[...] * sc + sh, 0.0)   # BN affine + ReLU, f32

    best_v = act(p00_ref)
    best_i = (2 * oh) * in_w + (2 * ow)
    for (dh, dw), ref in (((0, 1), p01_ref), ((1, 0), p10_ref), ((1, 1), p11_ref)):
        v = act(ref)
        i = (2 * oh + dh) * in_w + (2 * ow + dw)
        take = v > best_v               # strict > keeps the first max (PyTorch ties)
        best_v = jnp.where(take, v, best_v)
        best_i = jnp.where(take, i, best_i)
    out_ref[...] = best_v
    idx_ref[...] = best_i


def convolution_forward(x, w, b, gamma, beta, *, conv_tile_rows=None,
                        pool_tile_rows=None):
    """Forward pass of segnet.Convolution. x: NCHW float32 -> (pooled, indices)."""
    # Conv bias is uniform per channel and exactly cancelled by training-mode BN
    # mean subtraction, so it never affects the returned forward values.
    del b
    N, Cin, H, W = x.shape
    Cout = w.shape[0]
    assert H % 2 == 0 and W % 2 == 0
    H2, W2 = H // 2, W // 2
    Cp = max(128, -(-Cout // 128) * 128)        # lane-dense channel padding

    # Tile sizes (conv-output rows / pooled rows per grid step). Defaults keep
    # each f32 tile around <=1 MiB, far below scoped VMEM on v5e/v6e/v7x even
    # with double buffering; callers can override for grid-coverage tests.
    if conv_tile_rows is None:
        conv_tile_rows = max(1, (1 << 20) // (W * Cp * 4))
    if pool_tile_rows is None:
        pool_tile_rows = max(1, (1 << 19) // (W2 * Cp * 4))
    th = _largest_divisor_leq(H, conv_tile_rows)
    toh = _largest_divisor_leq(H2, pool_tile_rows)
    n_hb = H // th
    n_ob = H2 // toh

    # ---- glue (pure layout, no compute): NHWC + spatial 'same' pad, bf16 cast ----
    x_pad = jnp.pad(jnp.transpose(x, (0, 2, 3, 1)),
                    ((0, 0), (1, 1), (1, 1), (0, 0))).astype(jnp.bfloat16)
    w9 = jnp.transpose(w, (2, 3, 1, 0)).reshape(9, Cin, Cout)     # (k, ci, co)
    w9 = jnp.pad(w9, ((0, 0), (0, 0), (0, Cp - Cout))).astype(jnp.bfloat16)

    params = pltpu.CompilerParams(
        dimension_semantics=("parallel", "parallel"),
        vmem_limit_bytes=32 * 1024 * 1024)

    # ---- pass 1: conv (nine shifted bf16 matmuls) + one-pass BN partials ----
    conv_cost = pl.CostEstimate(
        flops=2 * N * H * W * 9 * Cin * Cp,
        transcendentals=0,
        bytes_accessed=(x_pad.size * 2 + w9.size * 2
                        + N * H * W * Cp * 4 + N * n_hb * 2 * Cp * 4))
    y, stats = pl.pallas_call(
        functools.partial(conv_stats_kernel, th=th, w_out=W, cin=Cin, cout_p=Cp),
        grid=(N, n_hb),
        in_specs=[
            pl.BlockSpec((1, H + 2, W + 2, Cin), lambda n, hb: (n, 0, 0, 0)),
            pl.BlockSpec((9, Cin, Cp), lambda n, hb: (0, 0, 0)),
        ],
        out_specs=(
            pl.BlockSpec((1, th, W, Cp), lambda n, hb: (n, hb, 0, 0)),
            pl.BlockSpec((1, 1, 2, Cp), lambda n, hb: (n, hb, 0, 0)),
        ),
        out_shape=(jax.ShapeDtypeStruct((N, H, W, Cp), jnp.float32),
                   jax.ShapeDtypeStruct((N, n_hb, 2, Cp), jnp.float32)),
        compiler_params=params,
        cost_estimate=conv_cost,
    )(x_pad, w9)

    # ---- tiny (Cout,)-sized BN stats reduction + affine folding (XLA side) ----
    count = float(N * H * W)
    s1 = jnp.sum(stats[:, :, 0, :], axis=(0, 1))
    s2 = jnp.sum(stats[:, :, 1, :], axis=(0, 1))
    mean = s1 / count
    var = jnp.maximum(s2 / count - mean * mean, 0.0)   # biased var, like PyTorch
    g = jnp.pad(gamma, (0, Cp - Cout))
    bt = jnp.pad(beta, (0, Cp - Cout))
    inv = jax.lax.rsqrt(var + 1e-5)
    scale = (g * inv).reshape(1, Cp).astype(jnp.float32)
    shift = (bt - mean * g * inv).reshape(1, Cp).astype(jnp.float32)

    # ---- pass 2: fused normalize + ReLU + 2x2 max pool on lane-dense phases ----
    phases = [y[:, dh::2, dw::2, :] for dh in range(2) for dw in range(2)]
    pooled, idx = pl.pallas_call(
        functools.partial(bn_relu_pool_kernel, toh=toh, in_w=W),
        grid=(N, n_ob),
        in_specs=[pl.BlockSpec((1, toh, W2, Cp), lambda n, ob: (n, ob, 0, 0))] * 4
                + [pl.BlockSpec((1, Cp), lambda n, ob: (0, 0))] * 2,
        out_specs=(
            pl.BlockSpec((1, toh, W2, Cp), lambda n, ob: (n, ob, 0, 0)),
            pl.BlockSpec((1, toh, W2, Cp), lambda n, ob: (n, ob, 0, 0)),
        ),
        out_shape=(jax.ShapeDtypeStruct((N, H2, W2, Cp), jnp.float32),
                   jax.ShapeDtypeStruct((N, H2, W2, Cp), jnp.int32)),
        compiler_params=params,
    )(*phases, scale, shift)

    # back to NCHW only on the 4x-smaller pooled result
    pooled = jnp.transpose(pooled[:, :, :, :Cout], (0, 3, 1, 2))
    idx = jnp.transpose(idx[:, :, :, :Cout], (0, 3, 1, 2))
    # TODO(synk): PyTorch returns int64 pooling indices and also updates the
    # BatchNorm running stats as a training side effect; int32 indices are
    # returned here (JAX x64 disabled) and running-stat updates are not emitted.
    return pooled, idx


if __name__ == "__main__":
    key = jax.random.PRNGKey(0)
    kx, kw, kb = jax.random.split(key, 3)
    N, Cin, Cout, H, W = 2, 4, 8, 16, 16

    x = jax.random.normal(kx, (N, Cin, H, W), jnp.float32)
    w = jax.random.normal(kw, (Cout, Cin, 3, 3), jnp.float32) * 0.1  # conv weight
    b = jax.random.normal(kb, (Cout,), jnp.float32) * 0.1            # conv bias
    gamma = jnp.ones((Cout,), jnp.float32)   # BatchNorm2d default init
    beta = jnp.zeros((Cout,), jnp.float32)

    # small tiles here so the test exercises multi-step grids in both passes
    fwd = jax.jit(functools.partial(convolution_forward,
                                    conv_tile_rows=8, pool_tile_rows=4))
    pooled, idx = jax.block_until_ready(fwd(x, w, b, gamma, beta))

    # ---- pure-JAX reference (same bf16-rounded conv inputs, f32 math) ----
    xb = x.astype(jnp.bfloat16).astype(jnp.float32)
    wb = w.astype(jnp.bfloat16).astype(jnp.float32)
    yr = jax.lax.conv_general_dilated(
        xb, wb, (1, 1), ((1, 1), (1, 1)),
        dimension_numbers=("NCHW", "OIHW", "NCHW")) + b[None, :, None, None]
    mean = yr.mean(axis=(0, 2, 3), keepdims=True)
    var = ((yr - mean) ** 2).mean(axis=(0, 2, 3), keepdims=True)
    yr = (yr - mean) / jnp.sqrt(var + 1e-5) * gamma[None, :, None, None] \
        + beta[None, :, None, None]
    yr = jnp.maximum(yr, 0.0)
    ref_pool = yr.reshape(N, Cout, H // 2, 2, W // 2, 2).max(axis=(3, 5))

    assert pooled.shape == (N, Cout, H // 2, W // 2)
    assert idx.dtype == jnp.int32
    assert jnp.allclose(pooled, ref_pool, atol=2e-3, rtol=2e-3), \
        float(jnp.max(jnp.abs(pooled - ref_pool)))
    gathered = jnp.take_along_axis(
        yr.reshape(N, Cout, H * W), idx.reshape(N, Cout, -1), axis=2
    ).reshape(pooled.shape)
    assert jnp.allclose(gathered, ref_pool, atol=2e-3, rtol=2e-3)

    print("KERNEL_OK")
</pallas_src>

<mosaic_0001>
module attributes {stable_mosaic.version = 11 : i64} {
  func.func @conv_stats_kernel(%arg0: i32, %arg1: i32, %arg2: memref<1x18x18x4xbf16, #tpu.memory_space<vmem>>, %arg3: memref<9x4x128xbf16, #tpu.memory_space<vmem>>, %arg4: memref<1x8x16x128xf32, #tpu.memory_space<vmem>>, %arg5: memref<1x1x2x128xf32, #tpu.memory_space<vmem>>) attributes {dimension_semantics = [#tpu.dimension_semantics<parallel>, #tpu.dimension_semantics<parallel>], iteration_bounds = array<i64: 2, 2>, scalar_prefetch = 0 : i64, scratch_operands = 0 : i64, tpu.core_type = #tpu.core_type<tc>, window_params = [{transform_indices = @transform_0, window_bounds = array<i64: 1, 18, 18, 4>}, {pipeline_mode = #tpu.pipeline_mode<synchronous>, transform_indices = @transform_1, window_bounds = array<i64: 9, 4, 128>}, {transform_indices = @transform_2, window_bounds = array<i64: 1, 8, 16, 128>}, {transform_indices = @transform_3, window_bounds = array<i64: 1, 1, 2, 128>}]} {
    %c8_i32 = arith.constant 8 : i32
    %0 = arith.muli %arg1, %c8_i32 : i32
    %c0_i32 = arith.constant 0 : i32
    %1 = arith.addi %0, %c0_i32 : i32
    %c0 = arith.constant 0 : index
    %2 = arith.index_cast %1 : i32 to index
    %c0_0 = arith.constant 0 : index
    %c0_1 = arith.constant 0 : index
    %3 = vector.load %arg2[%c0, %2, %c0_0, %c0_1] : memref<1x18x18x4xbf16, #tpu.memory_space<vmem>>, vector<1x8x16x4xbf16>
    %4 = vector.shape_cast %3 : vector<1x8x16x4xbf16> to vector<8x16x4xbf16>
    %5 = vector.shape_cast %4 : vector<8x16x4xbf16> to vector<128x4xbf16>
    %c0_2 = arith.constant 0 : index
    %c0_3 = arith.constant 0 : index
    %c0_4 = arith.constant 0 : index
    %6 = vector.load %arg3[%c0_2, %c0_3, %c0_4] : memref<9x4x128xbf16, #tpu.memory_space<vmem>>, vector<1x4x128xbf16>
    %7 = vector.shape_cast %6 : vector<1x4x128xbf16> to vector<4x128xbf16>
    %cst = arith.constant dense<0.000000e+00> : vector<128x128xf32>
    %8 = tpu.matmul %5, %7, %cst {dimension_numbers = #tpu.dot_dimension_numbers<[1], [0], [0], [1], [0, 0, 1, 1], [], []>} : vector<128x4xbf16>, vector<4x128xbf16>, vector<128x128xf32> -> vector<128x128xf32>
    %c0_i32_5 = arith.constant 0 : i32
    %9 = arith.addi %0, %c0_i32_5 : i32
    %c0_6 = arith.constant 0 : index
    %10 = arith.index_cast %9 : i32 to index
    %c1 = arith.constant 1 : index
    %c0_7 = arith.constant 0 : index
    %11 = vector.load %arg2[%c0_6, %10, %c1, %c0_7] : memref<1x18x18x4xbf16, #tpu.memory_space<vmem>>, vector<1x8x16x4xbf16>
    %12 = vector.shape_cast %11 : vector<1x8x16x4xbf16> to vector<8x16x4xbf16>
    %13 = vector.shape_cast %12 : vector<8x16x4xbf16> to vector<128x4xbf16>
    %c1_8 = arith.constant 1 : index
    %c0_9 = arith.constant 0 : index
    %c0_10 = arith.constant 0 : index
    %14 = vector.load %arg3[%c1_8, %c0_9, %c0_10] : memref<9x4x128xbf16, #tpu.memory_space<vmem>>, vector<1x4x128xbf16>
    %15 = vector.shape_cast %14 : vector<1x4x128xbf16> to vector<4x128xbf16>
    %cst_11 = arith.constant dense<0.000000e+00> : vector<128x128xf32>
    %16 = tpu.matmul %13, %15, %cst_11 {dimension_numbers = #tpu.dot_dimension_numbers<[1], [0], [0], [1], [0, 0, 1, 1], [], []>} : vector<128x4xbf16>, vector<4x128xbf16>, vector<128x128xf32> -> vector<128x128xf32>
    %17 = arith.addf %8, %16 : vector<128x128xf32>
    %c0_i32_12 = arith.constant 0 : i32
    %18 = arith.addi %0, %c0_i32_12 : i32
    %c0_13 = arith.constant 0 : index
    %19 = arith.index_cast %18 : i32 to index
    %c2 = arith.constant 2 : index
    %c0_14 = arith.constant 0 : index
    %20 = vector.load %arg2[%c0_13, %19, %c2, %c0_14] : memref<1x18x18x4xbf16, #tpu.memory_space<vmem>>, vector<1x8x16x4xbf16>
    %21 = vector.shape_cast %20 : vector<1x8x16x4xbf16> to vector<8x16x4xbf16>
    %22 = vector.shape_cast %21 : vector<8x16x4xbf16> to vector<128x4xbf16>
    %c2_15 = arith.constant 2 : index
    %c0_16 = arith.constant 0 : index
    %c0_17 = arith.constant 0 : index
    %23 = vector.load %arg3[%c2_15, %c0_16, %c0_17] : memref<9x4x128xbf16, #tpu.memory_space<vmem>>, vector<1x4x128xbf16>
    %24 = vector.shape_cast %23 : vector<1x4x128xbf16> to vector<4x128xbf16>
    %cst_18 = arith.constant dense<0.000000e+00> : vector<128x128xf32>
    %25 = tpu.matmul %22, %24, %cst_18 {dimension_numbers = #tpu.dot_dimension_numbers<[1], [0], [0], [1], [0, 0, 1, 1], [], []>} : vector<128x4xbf16>, vector<4x128xbf16>, vector<128x128xf32> -> vector<128x128xf32>
    %26 = arith.addf %17, %25 : vector<128x128xf32>
    %c1_i32 = arith.constant 1 : i32
    %27 = arith.addi %0, %c1_i32 : i32
    %c0_19 = arith.constant 0 : index
    %28 = arith.index_cast %27 : i32 to index
    %c0_20 = arith.constant 0 : index
    %c0_21 = arith.constant 0 : index
    %29 = vector.load %arg2[%c0_19, %28, %c0_20, %c0_21] : memref<1x18x18x4xbf16, #tpu.memory_space<vmem>>, vector<1x8x16x4xbf16>
    %30 = vector.shape_cast %29 : vector<1x8x16x4xbf16> to vector<8x16x4xbf16>
    %31 = vector.shape_cast %30 : vector<8x16x4xbf16> to vector<128x4xbf16>
    %c3 = arith.constant 3 : index
    %c0_22 = arith.constant 0 : index
    %c0_23 = arith.constant 0 : index
    %32 = vector.load %arg3[%c3, %c0_22, %c0_23] : memref<9x4x128xbf16, #tpu.memory_space<vmem>>, vector<1x4x128xbf16>
    %33 = vector.shape_cast %32 : vector<1x4x128xbf16> to vector<4x128xbf16>
    %cst_24 = arith.constant dense<0.000000e+00> : vector<128x128xf32>
    %34 = tpu.matmul %31, %33, %cst_24 {dimension_numbers = #tpu.dot_dimension_numbers<[1], [0], [0], [1], [0, 0, 1, 1], [], []>} : vector<128x4xbf16>, vector<4x128xbf16>, vector<128x128xf32> -> vector<128x128xf32>
    %35 = arith.addf %26, %34 : vector<128x128xf32>
    %c1_i32_25 = arith.constant 1 : i32
    %36 = arith.addi %0, %c1_i32_25 : i32
    %c0_26 = arith.constant 0 : index
    %37 = arith.index_cast %36 : i32 to index
    %c1_27 = arith.constant 1 : index
    %c0_28 = arith.constant 0 : index
    %38 = vector.load %arg2[%c0_26, %37, %c1_27, %c0_28] : memref<1x18x18x4xbf16, #tpu.memory_space<vmem>>, vector<1x8x16x4xbf16>
    %39 = vector.shape_cast %38 : vector<1x8x16x4xbf16> to vector<8x16x4xbf16>
    %40 = vector.shape_cast %39 : vector<8x16x4xbf16> to vector<128x4xbf16>
    %c4 = arith.constant 4 : index
    %c0_29 = arith.constant 0 : index
    %c0_30 = arith.constant 0 : index
    %41 = vector.load %arg3[%c4, %c0_29, %c0_30] : memref<9x4x128xbf16, #tpu.memory_space<vmem>>, vector<1x4x128xbf16>
    %42 = vector.shape_cast %41 : vector<1x4x128xbf16> to vector<4x128xbf16>
    %cst_31 = arith.constant dense<0.000000e+00> : vector<128x128xf32>
    %43 = tpu.matmul %40, %42, %cst_31 {dimension_numbers = #tpu.dot_dimension_numbers<[1], [0], [0], [1], [0, 0, 1, 1], [], []>} : vector<128x4xbf16>, vector<4x128xbf16>, vector<128x128xf32> -> vector<128x128xf32>
    %44 = arith.addf %35, %43 : vector<128x128xf32>
    %c1_i32_32 = arith.constant 1 : i32
    %45 = arith.addi %0, %c1_i32_32 : i32
    %c0_33 = arith.constant 0 : index
    %46 = arith.index_cast %45 : i32 to index
    %c2_34 = arith.constant 2 : index
    %c0_35 = arith.constant 0 : index
    %47 = vector.load %arg2[%c0_33, %46, %c2_34, %c0_35] : memref<1x18x18x4xbf16, #tpu.memory_space<vmem>>, vector<1x8x16x4xbf16>
    %48 = vector.shape_cast %47 : vector<1x8x16x4xbf16> to vector<8x16x4xbf16>
    %49 = vector.shape_cast %48 : vector<8x16x4xbf16> to vector<128x4xbf16>
    %c5 = arith.constant 5 : index
    %c0_36 = arith.constant 0 : index
    %c0_37 = arith.constant 0 : index
    %50 = vector.load %arg3[%c5, %c0_36, %c0_37] : memref<9x4x128xbf16, #tpu.memory_space<vmem>>, vector<1x4x128xbf16>
    %51 = vector.shape_cast %50 : vector<1x4x128xbf16> to vector<4x128xbf16>
    %cst_38 = arith.constant dense<0.000000e+00> : vector<128x128xf32>
    %52 = tpu.matmul %49, %51, %cst_38 {dimension_numbers = #tpu.dot_dimension_numbers<[1], [0], [0], [1], [0, 0, 1, 1], [], []>} : vector<128x4xbf16>, vector<4x128xbf16>, vector<128x128xf32> -> vector<128x128xf32>
    %53 = arith.addf %44, %52 : vector<128x128xf32>
    %c2_i32 = arith.constant 2 : i32
    %54 = arith.addi %0, %c2_i32 : i32
    %c0_39 = arith.constant 0 : index
    %55 = arith.index_cast %54 : i32 to index
    %c0_40 = arith.constant 0 : index
    %c0_41 = arith.constant 0 : index
    %56 = vector.load %arg2[%c0_39, %55, %c0_40, %c0_41] : memref<1x18x18x4xbf16, #tpu.memory_space<vmem>>, vector<1x8x16x4xbf16>
    %57 = vector.shape_cast %56 : vector<1x8x16x4xbf16> to vector<8x16x4xbf16>
    %58 = vector.shape_cast %57 : vector<8x16x4xbf16> to vector<128x4xbf16>
    %c6 = arith.constant 6 : index
    %c0_42 = arith.constant 0 : index
    %c0_43 = arith.constant 0 : index
    %59 = vector.load %arg3[%c6, %c0_42, %c0_43] : memref<9x4x128xbf16, #tpu.memory_space<vmem>>, vector<1x4x128xbf16>
    %60 = vector.shape_cast %59 : vector<1x4x128xbf16> to vector<4x128xbf16>
    %cst_44 = arith.constant dense<0.000000e+00> : vector<128x128xf32>
    %61 = tpu.matmul %58, %60, %cst_44 {dimension_numbers = #tpu.dot_dimension_numbers<[1], [0], [0], [1], [0, 0, 1, 1], [], []>} : vector<128x4xbf16>, vector<4x128xbf16>, vector<128x128xf32> -> vector<128x128xf32>
    %62 = arith.addf %53, %61 : vector<128x128xf32>
    %c2_i32_45 = arith.constant 2 : i32
    %63 = arith.addi %0, %c2_i32_45 : i32
    %c0_46 = arith.constant 0 : index
    %64 = arith.index_cast %63 : i32 to index
    %c1_47 = arith.constant 1 : index
    %c0_48 = arith.constant 0 : index
    %65 = vector.load %arg2[%c0_46, %64, %c1_47, %c0_48] : memref<1x18x18x4xbf16, #tpu.memory_space<vmem>>, vector<1x8x16x4xbf16>
    %66 = vector.shape_cast %65 : vector<1x8x16x4xbf16> to vector<8x16x4xbf16>
    %67 = vector.shape_cast %66 : vector<8x16x4xbf16> to vector<128x4xbf16>
    %c7 = arith.constant 7 : index
    %c0_49 = arith.constant 0 : index
    %c0_50 = arith.constant 0 : index
    %68 = vector.load %arg3[%c7, %c0_49, %c0_50] : memref<9x4x128xbf16, #tpu.memory_space<vmem>>, vector<1x4x128xbf16>
    %69 = vector.shape_cast %68 : vector<1x4x128xbf16> to vector<4x128xbf16>
    %cst_51 = arith.constant dense<0.000000e+00> : vector<128x128xf32>
    %70 = tpu.matmul %67, %69, %cst_51 {dimension_numbers = #tpu.dot_dimension_numbers<[1], [0], [0], [1], [0, 0, 1, 1], [], []>} : vector<128x4xbf16>, vector<4x128xbf16>, vector<128x128xf32> -> vector<128x128xf32>
    %71 = arith.addf %62, %70 : vector<128x128xf32>
    %c2_i32_52 = arith.constant 2 : i32
    %72 = arith.addi %0, %c2_i32_52 : i32
    %c0_53 = arith.constant 0 : index
    %73 = arith.index_cast %72 : i32 to index
    %c2_54 = arith.constant 2 : index
    %c0_55 = arith.constant 0 : index
    %74 = vector.load %arg2[%c0_53, %73, %c2_54, %c0_55] : memref<1x18x18x4xbf16, #tpu.memory_space<vmem>>, vector<1x8x16x4xbf16>
    %75 = vector.shape_cast %74 : vector<1x8x16x4xbf16> to vector<8x16x4xbf16>
    %76 = vector.shape_cast %75 : vector<8x16x4xbf16> to vector<128x4xbf16>
    %c8 = arith.constant 8 : index
    %c0_56 = arith.constant 0 : index
    %c0_57 = arith.constant 0 : index
    %77 = vector.load %arg3[%c8, %c0_56, %c0_57] : memref<9x4x128xbf16, #tpu.memory_space<vmem>>, vector<1x4x128xbf16>
    %78 = vector.shape_cast %77 : vector<1x4x128xbf16> to vector<4x128xbf16>
    %cst_58 = arith.constant dense<0.000000e+00> : vector<128x128xf32>
    %79 = tpu.matmul %76, %78, %cst_58 {dimension_numbers = #tpu.dot_dimension_numbers<[1], [0], [0], [1], [0, 0, 1, 1], [], []>} : vector<128x4xbf16>, vector<4x128xbf16>, vector<128x128xf32> -> vector<128x128xf32>
    %80 = arith.addf %71, %79 : vector<128x128xf32>
    %81 = vector.shape_cast %80 : vector<128x128xf32> to vector<8x16x128xf32>
    %c0_59 = arith.constant 0 : index
    %c0_60 = arith.constant 0 : index
    %c0_61 = arith.constant 0 : index
    %c0_62 = arith.constant 0 : index
    %82 = vector.load %arg4[%c0_59, %c0_60, %c0_61, %c0_62] : memref<1x8x16x128xf32, #tpu.memory_space<vmem>>, vector<1x8x16x128xf32>
    %83 = vector.shape_cast %82 : vector<1x8x16x128xf32> to vector<8x16x128xf32>
    %84 = vector.shape_cast %81 : vector<8x16x128xf32> to vector<1x8x16x128xf32>
    tpu.vector_store %arg4[%c0_59, %c0_60, %c0_61, %c0_62], %84 {strides = array<i32>} : memref<1x8x16x128xf32, #tpu.memory_space<vmem>>, vector<1x8x16x128xf32>,
    %cst_63 = arith.constant dense<0.000000e+00> : vector<128xf32>
    %85 = vector.multi_reduction <add>, %80, %cst_63 [0] : vector<128x128xf32> to vector<128xf32>
    %86 = vector.shape_cast %85 : vector<128xf32> to vector<1x128xf32>
    %c0_64 = arith.constant 0 : index
    %c0_65 = arith.constant 0 : index
    %c0_66 = arith.constant 0 : index
    %c0_67 = arith.constant 0 : index
    %87 = vector.load %arg5[%c0_64, %c0_65, %c0_66, %c0_67] : memref<1x1x2x128xf32, #tpu.memory_space<vmem>>, vector<1x1x1x128xf32>
    %88 = vector.shape_cast %87 : vector<1x1x1x128xf32> to vector<1x128xf32>
    %89 = vector.shape_cast %86 : vector<1x128xf32> to vector<1x1x1x128xf32>
    tpu.vector_store %arg5[%c0_64, %c0_65, %c0_66, %c0_67], %89 {strides = array<i32>} : memref<1x1x2x128xf32, #tpu.memory_space<vmem>>, vector<1x1x1x128xf32>,
    %90 = arith.mulf %80, %80 : vector<128x128xf32>
    %cst_68 = arith.constant dense<0.000000e+00> : vector<128xf32>
    %91 = vector.multi_reduction <add>, %90, %cst_68 [0] : vector<128x128xf32> to vector<128xf32>
    %92 = vector.shape_cast %91 : vector<128xf32> to vector<1x128xf32>
    %c0_69 = arith.constant 0 : index
    %c0_70 = arith.constant 0 : index
    %c1_71 = arith.constant 1 : index
    %c0_72 = arith.constant 0 : index
    %93 = vector.load %arg5[%c0_69, %c0_70, %c1_71, %c0_72] : memref<1x1x2x128xf32, #tpu.memory_space<vmem>>, vector<1x1x1x128xf32>
    %94 = vector.shape_cast %93 : vector<1x1x1x128xf32> to vector<1x128xf32>
    %95 = vector.shape_cast %92 : vector<1x128xf32> to vector<1x1x1x128xf32>
    tpu.vector_store %arg5[%c0_69, %c0_70, %c1_71, %c0_72], %95 {strides = array<i32>} : memref<1x1x2x128xf32, #tpu.memory_space<vmem>>, vector<1x1x1x128xf32>,
    return
  }
  func.func @transform_0(%arg0: i32, %arg1: i32) -> (i32, i32, i32, i32) {
    %c0_i32 = arith.constant 0 : i32
    %c0_i32_0 = arith.constant 0 : i32
    %c0_i32_1 = arith.constant 0 : i32
    %c0_i32_2 = arith.constant 0 : i32
    return %arg0, %c0_i32, %c0_i32_0, %c0_i32_1 : i32, i32, i32, i32
  }
  func.func @transform_1(%arg0: i32, %arg1: i32) -> (i32, i32, i32) {
    %c0_i32 = arith.constant 0 : i32
    %c0_i32_0 = arith.constant 0 : i32
    %c0_i32_1 = arith.constant 0 : i32
    %c0_i32_2 = arith.constant 0 : i32
    return %c0_i32, %c0_i32_0, %c0_i32_1 : i32, i32, i32
  }
  func.func @transform_2(%arg0: i32, %arg1: i32) -> (i32, i32, i32, i32) {
    %c0_i32 = arith.constant 0 : i32
    %c0_i32_0 = arith.constant 0 : i32
    %c0_i32_1 = arith.constant 0 : i32
    return %arg0, %arg1, %c0_i32, %c0_i32_0 : i32, i32, i32, i32
  }
  func.func @transform_3(%arg0: i32, %arg1: i32) -> (i32, i32, i32, i32) {
    %c0_i32 = arith.constant 0 : i32
    %c0_i32_0 = arith.constant 0 : i32
    %c0_i32_1 = arith.constant 0 : i32
    return %arg0, %arg1, %c0_i32, %c0_i32_0 : i32, i32, i32, i32
  }
}

module attributes {stable_mosaic.version = 11 : i64} {
  func.func @bn_relu_pool_kernel(%arg0: i32, %arg1: i32, %arg2: memref<1x4x8x128xf32, #tpu.memory_space<vmem>>, %arg3: memref<1x4x8x128xf32, #tpu.memory_space<vmem>>, %arg4: memref<1x4x8x128xf32, #tpu.memory_space<vmem>>, %arg5: memref<1x4x8x128xf32, #tpu.memory_space<vmem>>, %arg6: memref<1x128xf32, #tpu.memory_space<vmem>>, %arg7: memref<1x128xf32, #tpu.memory_space<vmem>>, %arg8: memref<1x4x8x128xf32, #tpu.memory_space<vmem>>, %arg9: memref<1x4x8x128xi32, #tpu.memory_space<vmem>>) attributes {dimension_semantics = [#tpu.dimension_semantics<parallel>, #tpu.dimension_semantics<parallel>], iteration_bounds = array<i64: 2, 2>, scalar_prefetch = 0 : i64, scratch_operands = 0 : i64, tpu.core_type = #tpu.core_type<tc>, window_params = [{transform_indices = @transform_0, window_bounds = array<i64: 1, 4, 8, 128>}, {transform_indices = @transform_1, window_bounds = array<i64: 1, 4, 8, 128>}, {transform_indices = @transform_2, window_bounds = array<i64: 1, 4, 8, 128>}, {transform_indices = @transform_3, window_bounds = array<i64: 1, 4, 8, 128>}, {pipeline_mode = #tpu.pipeline_mode<synchronous>, transform_indices = @transform_4, window_bounds = array<i64: 1, 128>}, {pipeline_mode = #tpu.pipeline_mode<synchronous>, transform_indices = @transform_5, window_bounds = array<i64: 1, 128>}, {transform_indices = @transform_6, window_bounds = array<i64: 1, 4, 8, 128>}, {transform_indices = @transform_7, window_bounds = array<i64: 1, 4, 8, 128>}]} {
    %c0 = arith.constant 0 : index
    %c0_0 = arith.constant 0 : index
    %0 = vector.load %arg6[%c0, %c0_0] : memref<1x128xf32, #tpu.memory_space<vmem>>, vector<1x128xf32>
    %c0_1 = arith.constant 0 : index
    %c0_2 = arith.constant 0 : index
    %1 = vector.load %arg7[%c0_1, %c0_2] : memref<1x128xf32, #tpu.memory_space<vmem>>, vector<1x128xf32>
    %2 = tpu.iota {dimensions = array<i32: 1>} : vector<1x4x8x128xi32>
    %c4_i32 = arith.constant 4 : i32
    %3 = arith.muli %arg1, %c4_i32 : i32
    %4 = vector.broadcast %3 : i32 to vector<1x4x8x128xi32>
    %5 = arith.addi %2, %4 : vector<1x4x8x128xi32>
    %6 = tpu.iota {dimensions = array<i32: 2>} : vector<1x4x8x128xi32>
    %c0_3 = arith.constant 0 : index
    %c0_4 = arith.constant 0 : index
    %c0_5 = arith.constant 0 : index
    %c0_6 = arith.constant 0 : index
    %7 = vector.load %arg2[%c0_3, %c0_4, %c0_5, %c0_6] : memref<1x4x8x128xf32, #tpu.memory_space<vmem>>, vector<1x4x8x128xf32>
    %8 = vector.shape_cast %0 : vector<1x128xf32> to vector<1x1x1x128xf32>
    %9 = vector.broadcast %8 : vector<1x1x1x128xf32> to vector<1x4x8x128xf32>
    %10 = arith.mulf %7, %9 : vector<1x4x8x128xf32>
    %11 = vector.shape_cast %1 : vector<1x128xf32> to vector<1x1x1x128xf32>
    %12 = vector.broadcast %11 : vector<1x1x1x128xf32> to vector<1x4x8x128xf32>
    %13 = arith.addf %10, %12 : vector<1x4x8x128xf32>
    %cst = arith.constant 0.000000e+00 : f32
    %14 = vector.broadcast %cst : f32 to vector<1x4x8x128xf32>
    %15 = arith.maximumf %13, %14 : vector<1x4x8x128xf32>
    %c2_i32 = arith.constant 2 : i32
    %16 = vector.broadcast %c2_i32 : i32 to vector<1x4x8x128xi32>
    %17 = arith.muli %16, %5 : vector<1x4x8x128xi32>
    %c16_i32 = arith.constant 16 : i32
    %18 = vector.broadcast %c16_i32 : i32 to vector<1x4x8x128xi32>
    %19 = arith.muli %17, %18 : vector<1x4x8x128xi32>
    %c2_i32_7 = arith.constant 2 : i32
    %20 = vector.broadcast %c2_i32_7 : i32 to vector<1x4x8x128xi32>
    %21 = arith.muli %20, %6 : vector<1x4x8x128xi32>
    %22 = arith.addi %19, %21 : vector<1x4x8x128xi32>
    %c0_8 = arith.constant 0 : index
    %c0_9 = arith.constant 0 : index
    %c0_10 = arith.constant 0 : index
    %c0_11 = arith.constant 0 : index
    %23 = vector.load %arg3[%c0_8, %c0_9, %c0_10, %c0_11] : memref<1x4x8x128xf32, #tpu.memory_space<vmem>>, vector<1x4x8x128xf32>
    %24 = vector.shape_cast %0 : vector<1x128xf32> to vector<1x1x1x128xf32>
    %25 = vector.broadcast %24 : vector<1x1x1x128xf32> to vector<1x4x8x128xf32>
    %26 = arith.mulf %23, %25 : vector<1x4x8x128xf32>
    %27 = vector.shape_cast %1 : vector<1x128xf32> to vector<1x1x1x128xf32>
    %28 = vector.broadcast %27 : vector<1x1x1x128xf32> to vector<1x4x8x128xf32>
    %29 = arith.addf %26, %28 : vector<1x4x8x128xf32>
    %cst_12 = arith.constant 0.000000e+00 : f32
    %30 = vector.broadcast %cst_12 : f32 to vector<1x4x8x128xf32>
    %31 = arith.maximumf %29, %30 : vector<1x4x8x128xf32>
    %c2_i32_13 = arith.constant 2 : i32
    %32 = vector.broadcast %c2_i32_13 : i32 to vector<1x4x8x128xi32>
    %33 = arith.muli %32, %5 : vector<1x4x8x128xi32>
    %c0_i32 = arith.constant 0 : i32
    %34 = vector.broadcast %c0_i32 : i32 to vector<1x4x8x128xi32>
    %35 = arith.addi %33, %34 : vector<1x4x8x128xi32>
    %c16_i32_14 = arith.constant 16 : i32
    %36 = vector.broadcast %c16_i32_14 : i32 to vector<1x4x8x128xi32>
    %37 = arith.muli %35, %36 : vector<1x4x8x128xi32>
    %c2_i32_15 = arith.constant 2 : i32
    %38 = vector.broadcast %c2_i32_15 : i32 to vector<1x4x8x128xi32>
    %39 = arith.muli %38, %6 : vector<1x4x8x128xi32>
    %c1_i32 = arith.constant 1 : i32
    %40 = vector.broadcast %c1_i32 : i32 to vector<1x4x8x128xi32>
    %41 = arith.addi %39, %40 : vector<1x4x8x128xi32>
    %42 = arith.addi %37, %41 : vector<1x4x8x128xi32>
    %43 = arith.cmpf ogt, %31, %15 : vector<1x4x8x128xf32>
    %44 = arith.select %43, %31, %15 : vector<1x4x8x128xi1>, vector<1x4x8x128xf32>
    %45 = arith.select %43, %42, %22 : vector<1x4x8x128xi1>, vector<1x4x8x128xi32>
    %c0_16 = arith.constant 0 : index
    %c0_17 = arith.constant 0 : index
    %c0_18 = arith.constant 0 : index
    %c0_19 = arith.constant 0 : index
    %46 = vector.load %arg4[%c0_16, %c0_17, %c0_18, %c0_19] : memref<1x4x8x128xf32, #tpu.memory_space<vmem>>, vector<1x4x8x128xf32>
    %47 = vector.shape_cast %0 : vector<1x128xf32> to vector<1x1x1x128xf32>
    %48 = vector.broadcast %47 : vector<1x1x1x128xf32> to vector<1x4x8x128xf32>
    %49 = arith.mulf %46, %48 : vector<1x4x8x128xf32>
    %50 = vector.shape_cast %1 : vector<1x128xf32> to vector<1x1x1x128xf32>
    %51 = vector.broadcast %50 : vector<1x1x1x128xf32> to vector<1x4x8x128xf32>
    %52 = arith.addf %49, %51 : vector<1x4x8x128xf32>
    %cst_20 = arith.constant 0.000000e+00 : f32
    %53 = vector.broadcast %cst_20 : f32 to vector<1x4x8x128xf32>
    %54 = arith.maximumf %52, %53 : vector<1x4x8x128xf32>
    %c2_i32_21 = arith.constant 2 : i32
    %55 = vector.broadcast %c2_i32_21 : i32 to vector<1x4x8x128xi32>
    %56 = arith.muli %55, %5 : vector<1x4x8x128xi32>
    %c1_i32_22 = arith.constant 1 : i32
    %57 = vector.broadcast %c1_i32_22 : i32 to vector<1x4x8x128xi32>
    %58 = arith.addi %56, %57 : vector<1x4x8x128xi32>
    %c16_i32_23 = arith.constant 16 : i32
    %59 = vector.broadcast %c16_i32_23 : i32 to vector<1x4x8x128xi32>
    %60 = arith.muli %58, %59 : vector<1x4x8x128xi32>
    %c2_i32_24 = arith.constant 2 : i32
    %61 = vector.broadcast %c2_i32_24 : i32 to vector<1x4x8x128xi32>
    %62 = arith.muli %61, %6 : vector<1x4x8x128xi32>
    %c0_i32_25 = arith.constant 0 : i32
    %63 = vector.broadcast %c0_i32_25 : i32 to vector<1x4x8x128xi32>
    %64 = arith.addi %62, %63 : vector<1x4x8x128xi32>
    %65 = arith.addi %60, %64 : vector<1x4x8x128xi32>
    %66 = arith.cmpf ogt, %54, %44 : vector<1x4x8x128xf32>
    %67 = arith.select %66, %54, %44 : vector<1x4x8x128xi1>, vector<1x4x8x128xf32>
    %68 = arith.select %66, %65, %45 : vector<1x4x8x128xi1>, vector<1x4x8x128xi32>
    %c0_26 = arith.constant 0 : index
    %c0_27 = arith.constant 0 : index
    %c0_28 = arith.constant 0 : index
    %c0_29 = arith.constant 0 : index
    %69 = vector.load %arg5[%c0_26, %c0_27, %c0_28, %c0_29] : memref<1x4x8x128xf32, #tpu.memory_space<vmem>>, vector<1x4x8x128xf32>
    %70 = vector.shape_cast %0 : vector<1x128xf32> to vector<1x1x1x128xf32>
    %71 = vector.broadcast %70 : vector<1x1x1x128xf32> to vector<1x4x8x128xf32>
    %72 = arith.mulf %69, %71 : vector<1x4x8x128xf32>
    %73 = vector.shape_cast %1 : vector<1x128xf32> to vector<1x1x1x128xf32>
    %74 = vector.broadcast %73 : vector<1x1x1x128xf32> to vector<1x4x8x128xf32>
    %75 = arith.addf %72, %74 : vector<1x4x8x128xf32>
    %cst_30 = arith.constant 0.000000e+00 : f32
    %76 = vector.broadcast %cst_30 : f32 to vector<1x4x8x128xf32>
    %77 = arith.maximumf %75, %76 : vector<1x4x8x128xf32>
    %c2_i32_31 = arith.constant 2 : i32
    %78 = vector.broadcast %c2_i32_31 : i32 to vector<1x4x8x128xi32>
    %79 = arith.muli %78, %5 : vector<1x4x8x128xi32>
    %c1_i32_32 = arith.constant 1 : i32
    %80 = vector.broadcast %c1_i32_32 : i32 to vector<1x4x8x128xi32>
    %81 = arith.addi %79, %80 : vector<1x4x8x128xi32>
    %c16_i32_33 = arith.constant 16 : i32
    %82 = vector.broadcast %c16_i32_33 : i32 to vector<1x4x8x128xi32>
    %83 = arith.muli %81, %82 : vector<1x4x8x128xi32>
    %c2_i32_34 = arith.constant 2 : i32
    %84 = vector.broadcast %c2_i32_34 : i32 to vector<1x4x8x128xi32>
    %85 = arith.muli %84, %6 : vector<1x4x8x128xi32>
    %c1_i32_35 = arith.constant 1 : i32
    %86 = vector.broadcast %c1_i32_35 : i32 to vector<1x4x8x128xi32>
    %87 = arith.addi %85, %86 : vector<1x4x8x128xi32>
    %88 = arith.addi %83, %87 : vector<1x4x8x128xi32>
    %89 = arith.cmpf ogt, %77, %67 : vector<1x4x8x128xf32>
    %90 = arith.select %89, %77, %67 : vector<1x4x8x128xi1>, vector<1x4x8x128xf32>
    %91 = arith.select %89, %88, %68 : vector<1x4x8x128xi1>, vector<1x4x8x128xi32>
    %c0_36 = arith.constant 0 : index
    %c0_37 = arith.constant 0 : index
    %c0_38 = arith.constant 0 : index
    %c0_39 = arith.constant 0 : index
    %92 = vector.load %arg8[%c0_36, %c0_37, %c0_38, %c0_39] : memref<1x4x8x128xf32, #tpu.memory_space<vmem>>, vector<1x4x8x128xf32>
    tpu.vector_store %arg8[%c0_36, %c0_37, %c0_38, %c0_39], %90 {strides = array<i32>} : memref<1x4x8x128xf32, #tpu.memory_space<vmem>>, vector<1x4x8x128xf32>,
    %c0_40 = arith.constant 0 : index
    %c0_41 = arith.constant 0 : index
    %c0_42 = arith.constant 0 : index
    %c0_43 = arith.constant 0 : index
    %93 = vector.load %arg9[%c0_40, %c0_41, %c0_42, %c0_43] : memref<1x4x8x128xi32, #tpu.memory_space<vmem>>, vector<1x4x8x128xi32>
    tpu.vector_store %arg9[%c0_40, %c0_41, %c0_42, %c0_43], %91 {strides = array<i32>} : memref<1x4x8x128xi32, #tpu.memory_space<vmem>>, vector<1x4x8x128xi32>,
    return
  }
  func.func @transform_0(%arg0: i32, %arg1: i32) -> (i32, i32, i32, i32) {
    %c0_i32 = arith.constant 0 : i32
    %c0_i32_0 = arith.constant 0 : i32
    %c0_i32_1 = arith.constant 0 : i32
    return %arg0, %arg1, %c0_i32, %c0_i32_0 : i32, i32, i32, i32
  }
  func.func @transform_1(%arg0: i32, %arg1: i32) -> (i32, i32, i32, i32) {
    %c0_i32 = arith.constant 0 : i32
    %c0_i32_0 = arith.constant 0 : i32
    %c0_i32_1 = arith.constant 0 : i32
    return %arg0, %arg1, %c0_i32, %c0_i32_0 : i32, i32, i32, i32
  }
  func.func @transform_2(%arg0: i32, %arg1: i32) -> (i32, i32, i32, i32) {
    %c0_i32 = arith.constant 0 : i32
    %c0_i32_0 = arith.constant 0 : i32
    %c0_i32_1 = arith.constant 0 : i32
    return %arg0, %arg1, %c0_i32, %c0_i32_0 : i32, i32, i32, i32
  }
  func.func @transform_3(%arg0: i32, %arg1: i32) -> (i32, i32, i32, i32) {
    %c0_i32 = arith.constant 0 : i32
    %c0_i32_0 = arith.constant 0 : i32
    %c0_i32_1 = arith.constant 0 : i32
    return %arg0, %arg1, %c0_i32, %c0_i32_0 : i32, i32, i32, i32
  }
  func.func @transform_4(%arg0: i32, %arg1: i32) -> (i32, i32) {
    %c0_i32 = arith.constant 0 : i32
    %c0_i32_0 = arith.constant 0 : i32
    %c0_i32_1 = arith.constant 0 : i32
    return %c0_i32, %c0_i32_0 : i32, i32
  }
  func.func @transform_5(%arg0: i32, %arg1: i32) -> (i32, i32) {
    %c0_i32 = arith.constant 0 : i32
    %c0_i32_0 = arith.constant 0 : i32
    %c0_i32_1 = arith.constant 0 : i32
    return %c0_i32, %c0_i32_0 : i32, i32
  }
  func.func @transform_6(%arg0: i32, %arg1: i32) -> (i32, i32, i32, i32) {
    %c0_i32 = arith.constant 0 : i32
    %c0_i32_0 = arith.constant 0 : i32
    %c0_i32_1 = arith.constant 0 : i32
    return %arg0, %arg1, %c0_i32, %c0_i32_0 : i32, i32, i32, i32
  }
  func.func @transform_7(%arg0: i32, %arg1: i32) -> (i32, i32, i32, i32) {
    %c0_i32 = arith.constant 0 : i32
    %c0_i32_0 = arith.constant 0 : i32
    %c0_i32_1 = arith.constant 0 : i32
    return %arg0, %arg1, %c0_i32, %c0_i32_0 : i32, i32, i32, i32
  }
}

</mosaic_0001>

<bundles_post_ra>
// kernel: convolution_forward.3
= control target key start
LH: loop header
LB: loop body
LE: loop exit
PB: predicated region body
PF: predicated region fallthrough
CT: control target
= control target key end

     0   :  { %s955_s24 = smov 0   ;;  %s957_s25 = smov 0   ;;  %s1260_s0 = inlined_call_operand.vmem [shape: f32[2,8,8,128], index: 0, kind: input, shape index: {}]   ;;  %s1261_s1 = inlined_call_operand.vmem [shape: f32[2,8,8,128], index: 1, kind: input, shape index: {}]   ;;  %s1262_s2 = inlined_call_operand.vmem [shape: f32[2,8,8,128], index: 2, kind: input, shape index: {}]   ;;  %s1263_s3 = inlined_call_operand.vmem [shape: f32[2,8,8,128], index: 3, kind: input, shape index: {}]   ;;  %s1264_s4 = inlined_call_operand.vmem [shape: f32[1,128], index: 4, kind: input, shape index: {}]   ;;  %s1265_s5 = inlined_call_operand.vmem [shape: f32[1,128], index: 5, kind: input, shape index: {}]   ;;  %s1266_s6 = inlined_call_operand.vmem [shape: f32[2,8,8,128], index: 6, kind: output, shape index: {0}]   ;;  %s1267_s7 = inlined_call_operand.vmem [shape: s32[2,8,8,128], index: 7, kind: output, shape index: {1}]  }
   0x1   :  { %s959_s26 = smov 0   ;;  %s961_s27 = smov 0  }
   0x2   :  { %s963_s28 = smov 0  }
   0x3 LB: > { %s27_s29 = sadd.s32 1, %s905_s26  ;;  %s30_s30 = sadd.s32 1, %s909_s27  ;;  %s913_s28 = sphi %s963_s28, %s18_s28   ;;  %s909_s27 = sphi %s961_s27, %s1295_s27   ;;  %s905_s26 = sphi %s959_s26, %s1294_s26   ;;  %s901_s25 = sphi %s957_s25, %s1293_s25   ;;  %s897_s24 = sphi %s955_s24, %s1292_s24  }
   0x4   : > { %p28_p0 = scmp.ge.s32.totalorder %s27_s29, 2  ;;  %p811_p1 = scmp.ge.s32.totalorder %s913_s28, 1 }
   0x5   : > { %p314_p2 = scmp.lt.s32.totalorder %s913_s28, 5 }
   0x6   : > { %s1297_s29 = smov (%p28_p0, %s27_s29), 0  ;;  %s1299_s30 = smov (!%p28_p0, %s30_s30), %s909_s27 }
   0x7   : > { %p315_p3 = pnand %p811_p1, %p314_p2  ;;  %p32_p4 = scmp.ge.s32.totalorder %s1299_s30, 2 }
   0x8   : > { %s812_s8 = sshll.u32 (!%p315_p3), %s897_s24, 2  ;;  %p391_p5 = scmp.lt.s32.totalorder (!%p315_p3), %s901_s25, 1  ;;  %v457_v0 = vlaneseq (!%p315_p3)  ;;  %v994_v12 = vld [vmem:[%s1264_s4] ss:$0 sm:$0xff] (!%p315_p3) }
   0x9   : > { %s1301_s30 = smov (%p32_p4, %s1299_s30), 0  ;;  %318 = sbr.rel (%p315_p3) target bundleno = 53 (0x35), region = 44 }
   0xa   : > { %p393_p6 = scmp.lt.s32.totalorder (!%p315_p3), %s812_s8, 7  ;;  %v453_v1 = vstv (!%p315_p3), %s812_s8  ;;  %v458_v2 = vshrl.u32 (!%p315_p3), %v457_v0, 7  ;;  %v1018_v17 = vld [vmem:[%s1265_s5] ss:$0 sm:$0xff] (!%p315_p3) }
   0xb   : > { %v487_v3 = vmul.u32 (!%p315_p3), 2, %v453_v1  ;;  %v454_v4 = vadd.s32 (!%p315_p3), 1, %v453_v1  ;;  %v455_v5 = vadd.s32 (!%p315_p3), 2, %v453_v1  ;;  %v985_v6 = vadd.s32 (!%p315_p3), 3, %v453_v1 }
   0xc   : > { %v987_v8 = vmul.u32 (!%p315_p3), 2, %v458_v2 }
   0xd   : > { %v491_v7 = vmul.u32 (!%p315_p3), 16, %v487_v3  ;;  %v549_v9 = vadd.s32 (!%p315_p3), 1, %v487_v3  ;;  %v488_v10 = vmul.u32 (!%p315_p3), 2, %v454_v4 }
   0xe   : > { %v489_v11 = vmul.u32 (!%p315_p3), 2, %v455_v5  ;;  %v1000_v14 = vadd.s32 (!%p315_p3), 1, %v987_v8  ;;  %v490_v16 = vmul.u32 (!%p315_p3), 2, %v985_v6 }
   0xf   : > { %v997_v13 = vadd.s32 (!%p315_p3), %v987_v8, %v491_v7  ;;  %v553_v15 = vmul.u32 (!%p315_p3), 16, %v549_v9  ;;  %v492_v18 = vmul.u32 (!%p315_p3), 16, %v488_v10  ;;  %v1020_v19 = vadd.s32 (!%p315_p3), 1, %v488_v10 }
  0x10   : > { %s1303_s25 = smov (!%p391_p5, %s901_s25), 1  ;;  %s1305_s8 = smov (!%p393_p6, %s812_s8), 7  ;;  %v1022_v20 = vmul.u32 16, %v489_v11  ;;  %v1024_v21 = vadd.s32 1, %v489_v11  ;;  %v1042_v25 = vadd.s32 %v1000_v14, %v491_v7  ;;  %v1052_v28 = vmul.u32 16, %v490_v16 }
  0x11   : > { %s813_s9 = sshll.u32 %s1303_s25, 3  ;;  %v1045_v26 = vadd.s32 %v553_v15, %v987_v8  ;;  %v1048_v27 = vadd.s32 %v553_v15, %v1000_v14  ;;  %v1061_v35 = vadd.s32 %v987_v8, %v492_v18  ;;  %v1069_v41 = vadd.s32 %v1000_v14, %v492_v18 }
  0x12   : > { %s396_s10 = sadd.s32 %s813_s9, %s1305_s8 }
  0x13   : > { %s989_s11 = sshll.u32 %s396_s10, 3 }
  0x14   : > { %s1007_s16 = scalar_lea.vmem %s1260_s0, %s989_s11  ;;  %s1013_s19 = scalar_lea.vmem %s1261_s1, %s989_s11 }
  0x15   : > { %s1030_s24 = scalar_lea.vmem %s1262_s2, %s989_s11  ;;  %s1036_s9 = scalar_lea.vmem %s1263_s3, %s989_s11  ;;  %v459_v22 = vld [vmem:[%s1007_s16] sm:$0xff]  ;;  %v460_v24 = vld [vmem:[%s1007_s16 + $0x8] sm:$0xff]  ;;  %v461_v50 = vld [vmem:[%s1007_s16 + $0x10] sm:$0xff] }
  0x16   : > { %v500_v23 = vld [vmem:[%s1013_s19] sm:$0xff]  ;;  %v469_v29 = vmul.f32 %v994_v12, %v459_v22  ;;  %v470_v33 = vmul.f32 %v994_v12, %v460_v24  ;;  %v501_v34 = vld [vmem:[%s1013_s19 + $0x8] sm:$0xff]  ;;  %v502_v51 = vld [vmem:[%s1013_s19 + $0x10] sm:$0xff]  ;;  %v471_v63 = vmul.f32 %v994_v12, %v461_v50  ;;  %s1110_s13 = scalar_lea.vmem %s1266_s6, %s989_s11 }
  0x17   : > { %v504_v30 = vmul.f32 %v994_v12, %v500_v23  ;;  %v533_v31 = vld [vmem:[%s1030_s24] sm:$0xff]  ;;  %v505_v38 = vmul.f32 %v994_v12, %v501_v34  ;;  %v534_v39 = vld [vmem:[%s1030_s24 + $0x8] sm:$0xff]  ;;  %v535_v56 = vld [vmem:[%s1030_s24 + $0x10] sm:$0xff]  ;;  %v506_v0 = vmul.f32 %v994_v12, %v502_v51 }
  0x18   : > { %v573_v32 = vld [vmem:[%s1036_s9] sm:$0xff]  ;;  %v537_v36 = vmul.f32 %v994_v12, %v533_v31  ;;  %v574_v40 = vld [vmem:[%s1036_s9 + $0x8] sm:$0xff]  ;;  %v479_v42 = vadd.f32 %v1018_v17, %v469_v29  ;;  %v480_v44 = vadd.f32 %v1018_v17, %v470_v33  ;;  %v538_v45 = vmul.f32 %v994_v12, %v534_v39  ;;  %v575_v1 = vld [vmem:[%s1036_s9 + $0x10] sm:$0xff] }
  0x19   : > { %v577_v37 = vmul.f32 %v994_v12, %v573_v32  ;;  %v508_v43 = vadd.f32 %v1018_v17, %v504_v30  ;;  %v509_v48 = vadd.f32 %v1018_v17, %v505_v38  ;;  %v578_v49 = vmul.f32 %v994_v12, %v574_v40  ;;  %v462_v24 = vld [vmem:[%s1007_s16 + $0x18] sm:$0xff]  ;;  %s1161_s16 = scalar_lea.vmem %s1267_s7, %s989_s11 }
  0x1a   : > { %v541_v46 = vadd.f32 %v1018_v17, %v537_v36  ;;  %v483_v52 = vmax.f32 %v479_v42, 0.0  ;;  %v484_v54 = vmax.f32 %v480_v44, 0.0  ;;  %v542_v55 = vadd.f32 %v1018_v17, %v538_v45  ;;  %v503_v29 = vld [vmem:[%s1013_s19 + $0x18] sm:$0xff] }
  0x1b   : > { %v581_v47 = vadd.f32 %v1018_v17, %v577_v37  ;;  %v512_v53 = vmax.f32 %v508_v43, 0.0  ;;  %v513_v59 = vmax.f32 %v509_v48, 0.0  ;;  %v582_v60 = vadd.f32 %v1018_v17, %v578_v49  ;;  %v536_v34 = vld [vmem:[%s1030_s24 + $0x18] sm:$0xff] }
  0x1c   : > { %v545_v57 = vmax.f32 %v541_v46, 0.0  ;;  %v546_v62 = vmax.f32 %v542_v55, 0.0  ;;  %v539_v5 = vmul.f32 %v994_v12, %v535_v56  ;;  %v481_v10 = vadd.f32 %v1018_v17, %v471_v63  ;;  %v576_v36 = vld [vmem:[%s1036_s9 + $0x18] sm:$0xff] }
  0x1d   : > { %v585_v58 = vmax.f32 %v581_v47, 0.0  ;;  %vm1084_vm0 = vcmp.gt.f32.partialorder %v512_v53, %v483_v52  ;;  %vm1093_vm1 = vcmp.gt.f32.partialorder %v513_v59, %v484_v54  ;;  %v586_v4 = vmax.f32 %v582_v60, 0.0 }
  0x1e   : > { %v525_v2 = vsel %vm1084_vm0, %v512_v53, %v483_v52  ;;  %v526_v9 = vsel %vm1093_vm1, %v513_v59, %v484_v54  ;;  %v510_v11 = vadd.f32 %v1018_v17, %v506_v0  ;;  %v543_v22 = vadd.f32 %v1018_v17, %v539_v5 }
  0x1f   : > { %vm1098_vm2 = vcmp.gt.f32.partialorder %v545_v57, %v525_v2  ;;  %vm1114_vm3 = vcmp.gt.f32.partialorder %v546_v62, %v526_v9  ;;  %v579_v23 = vmul.f32 %v994_v12, %v575_v1  ;;  %v485_v32 = vmax.f32 %v481_v10, 0.0 }
  0x20   : > { %v565_v15 = vsel %vm1098_vm2, %v545_v57, %v525_v2  ;;  %v566_v31 = vsel %vm1114_vm3, %v546_v62, %v526_v9  ;;  %v514_v33 = vmax.f32 %v510_v11, 0.0  ;;  %v547_v39 = vmax.f32 %v543_v22, 0.0 }
  0x21   : > { %vm1122_vm4 = vcmp.gt.f32.partialorder %v585_v58, %v565_v15  ;;  %vm1132_vm5 = vcmp.gt.f32.partialorder %v586_v4, %v566_v31  ;;  %v583_v40 = vadd.f32 %v1018_v17, %v579_v23  ;;  %v472_v44 = vmul.f32 %v994_v12, %v462_v24 }
  0x22   : > { %v597_v37 = vsel %vm1122_vm4, %v585_v58, %v565_v15  ;;  %v598_v42 = vsel %vm1132_vm5, %v586_v4, %v566_v31  ;;  %vm1140_vm6 = vcmp.gt.f32.partialorder %v514_v33, %v485_v32  ;;  %v507_v45 = vmul.f32 %v994_v12, %v503_v29 }
  0x23   : > { %605 = vst [vmem:[%s1110_s13] sm:$0xff] %v597_v37  ;;  %606 = vst [vmem:[%s1110_s13 + $0x8] sm:$0xff] %v598_v42  ;;  %v527_v46 = vsel %vm1140_vm6, %v514_v33, %v485_v32  ;;  %v587_v47 = vmax.f32 %v583_v40, 0.0  ;;  %v540_v48 = vmul.f32 %v994_v12, %v536_v34  ;;  %v580_v49 = vmul.f32 %v994_v12, %v576_v36 }
  0x24   : > { %vm1151_vm7 = vcmp.gt.f32.partialorder %v547_v39, %v527_v46  ;;  %v482_v51 = vadd.f32 %v1018_v17, %v472_v44  ;;  %v511_v52 = vadd.f32 %v1018_v17, %v507_v45  ;;  %v529_v12 = vsel %vm1084_vm0, %v1042_v25, %v997_v13 }
  0x25   : > { %v567_v53 = vsel %vm1151_vm7, %v547_v39, %v527_v46  ;;  %v544_v54 = vadd.f32 %v1018_v17, %v540_v48  ;;  %v584_v55 = vadd.f32 %v1018_v17, %v580_v49  ;;  %v569_v56 = vsel %vm1098_vm2, %v1045_v26, %v529_v12 }
  0x26   : > { %vm1174_vm8 = vcmp.gt.f32.partialorder %v587_v47, %v567_v53  ;;  %v486_v58 = vmax.f32 %v482_v51, 0.0  ;;  %v515_v59 = vmax.f32 %v511_v52, 0.0  ;;  %v601_v13 = vsel %vm1122_vm4, %v1048_v27, %v569_v56 }
  0x27   : > { %v599_v25 = vsel %vm1174_vm8, %v587_v47, %v567_v53  ;;  %v548_v60 = vmax.f32 %v544_v54, 0.0  ;;  %v588_v61 = vmax.f32 %v584_v55, 0.0  ;;  %609 = vst [vmem:[%s1161_s16] sm:$0xff] %v601_v13  ;;  %v554_v26 = vmul.u32 16, %v1020_v19 }
  0x28   : > { %607 = vst [vmem:[%s1110_s13 + $0x10] sm:$0xff] %v599_v25  ;;  %vm1185_vm9 = vcmp.gt.f32.partialorder %v515_v59, %v486_v58  ;;  %v498_v62 = vadd.s32 %v987_v8, %v1022_v20  ;;  %v519_v63 = vadd.s32 %v1000_v14, %v1022_v20  ;;  %v530_v0 = vsel %vm1093_vm1, %v1069_v41, %v1061_v35 }
  0x29   : > { %v528_v27 = vsel %vm1185_vm9, %v515_v59, %v486_v58  ;;  %v555_v1 = vmul.u32 16, %v1024_v21  ;;  %v499_v19 = vadd.s32 %v987_v8, %v1052_v28  ;;  %v558_v20 = vadd.s32 %v554_v26, %v987_v8 }
  0x2a   : > { %vm1203_vm10 = vcmp.gt.f32.partialorder %v548_v60, %v528_v27  ;;  %v590_v4 = vadd.s32 %v554_v26, %v1000_v14  ;;  %v531_v3 = vsel %vm1140_vm6, %v519_v63, %v498_v62  ;;  %v520_v5 = vadd.s32 %v1000_v14, %v1052_v28 }
  0x2b   : > { %v568_v21 = vsel %vm1203_vm10, %v548_v60, %v528_v27  ;;  %v559_v35 = vadd.s32 %v555_v1, %v987_v8  ;;  %v591_v41 = vadd.s32 %v555_v1, %v1000_v14  ;;  %v570_v9 = vsel %vm1114_vm3, %v558_v20, %v530_v0 }
  0x2c   : > { %vm1217_vm11 = vcmp.gt.f32.partialorder %v588_v61, %v568_v21  ;;  %v552_v10 = vadd.s32 1, %v490_v16  ;;  %v602_v15 = vsel %vm1132_vm5, %v590_v4, %v570_v9  ;;  %v532_v6 = vsel %vm1185_vm9, %v520_v5, %v499_v19 }
  0x2d   : > { %v600_v11 = vsel %vm1217_vm11, %v588_v61, %v568_v21  ;;  %v571_v28 = vsel %vm1151_vm7, %v559_v35, %v531_v3  ;;  %610 = vst [vmem:[%s1161_s16 + $0x8] sm:$0xff] %v602_v15 }
  0x2e   : > { %608 = vst [vmem:[%s1110_s13 + $0x18] sm:$0xff] %v600_v11  ;;  %v603_v22 = vsel %vm1174_vm8, %v591_v41, %v571_v28  ;;  %v556_v18 = vmul.u32 16, %v552_v10 }
  0x2f   : > { %611 = vst [vmem:[%s1161_s16 + $0x10] sm:$0xff] %v603_v22 }
  0x30   : > { %v560_v16 = vadd.s32 %v556_v18, %v987_v8  ;;  %v592_v23 = vadd.s32 %v556_v18, %v1000_v14 }
  0x32   : > { %v572_v24 = vsel %vm1203_vm10, %v560_v16, %v532_v6 }
  0x33   : > { %v604_v29 = vsel %vm1217_vm11, %v592_v23, %v572_v24 }
  0x34   : > { %612 = vst [vmem:[%s1161_s16 + $0x18] sm:$0xff] %v604_v29 }
  0x35 PF: > { %s18_s28 = sadd.s32 1, %s913_s28   ;;  %s1292_s24 = smov %s905_s26 }
  0x36   : > { %p15_p7 = scmp.ge.s32.totalorder %s18_s28, 6   ;;  %s1293_s25 = smov %s909_s27 }
  0x37   : > { %s1294_s26 = smov %s1297_s29  ;;  %s1295_s27 = smov %s1301_s30 }
  0x38   :  { %17 = sbr.rel (!%p15_p7) target bundleno = 3 (0x3), region = 95 }

// kernel: convolution_forward.2
= control target key start
LH: loop header
LB: loop body
LE: loop exit
PB: predicated region body
PF: predicated region fallthrough
CT: control target
= control target key end

     0   :  { %s3709_s12 = smov 0   ;;  %s3711_s13 = smov 0   ;;  %s4649_s0 = inlined_call_operand.vmem [shape: bf16[2,18,18,4], index: 0, kind: input, shape index: {}]   ;;  %s4650_s1 = inlined_call_operand.vmem [shape: bf16[9,4,128], index: 1, kind: input, shape index: {}]   ;;  %s4651_s2 = inlined_call_operand.vmem [shape: f32[2,16,16,128], index: 2, kind: output, shape index: {0}]   ;;  %s4652_s3 = inlined_call_operand.vmem [shape: f32[2,2,2,128], index: 3, kind: output, shape index: {1}]  }
   0x1   :  { %s3713_s14 = smov 0   ;;  %s3715_s15 = smov 0  }
   0x2   :  { %s3717_s16 = smov 0  }
   0x3 LB: > { %s23_s17 = sadd.s32 1, %s3679_s14  ;;  %s26_s18 = sadd.s32 1, %s3683_s15  ;;  %s3687_s16 = sphi %s3717_s16, %s14_s16   ;;  %s3683_s15 = sphi %s3715_s15, %s4678_s15   ;;  %s3679_s14 = sphi %s3713_s14, %s4677_s14   ;;  %s3675_s13 = sphi %s3711_s13, %s4676_s13   ;;  %s3671_s12 = sphi %s3709_s12, %s4675_s12  }
   0x4   : > { %p24_p0 = scmp.ge.s32.totalorder %s23_s17, 2  ;;  %p2910_p1 = scmp.ge.s32.totalorder %s3687_s16, 1 }
   0x5   : > { %p156_p2 = scmp.lt.s32.totalorder %s3687_s16, 5 }
   0x6   : > { %s4680_s17 = smov (%p24_p0, %s23_s17), 0  ;;  %s4682_s18 = smov (!%p24_p0, %s26_s18), %s3683_s15 }
   0x7   : > { %p157_p3 = pnand %p2910_p1, %p156_p2  ;;  %p28_p4 = scmp.ge.s32.totalorder %s4682_s18, 2 }
   0x9   : > { %s4684_s18 = smov (%p28_p4, %s4682_s18), 0  ;;  %160 = sbr.rel (%p157_p3) target bundleno = 437 (0x1b5), region = 28 }
  0x10   : > { %v2921_v0 = vld [vmem:[%s4650_s1 + $0x2] sm:$0x3]  ;;  %vm493_vm0 = vcmask 1041408   ;;  %v3038_v1 = vld [vmem:[%s4650_s1 + $0x8] sm:$0x3]  ;;  %p193_p5 = scmp.lt.s32.totalorder %s3675_s13, 1 }
  0x11   : > { %3573 = vmatprep.subr.msk.bf16.mxu1 %vm493_vm0, %v2921_v0  ;;  %3577 = vmatprep.subr.msk.bf16.mxu0 %vm493_vm0, %v3038_v1  ;;  %v495_v2 = vsel %vm493_vm0, %v2921_v0, 0  ;;  %v3751_v3 = vsel %vm493_vm0, %v3038_v1, 0  ;;  %v238_v4 = vld [vmem:[%s4650_s1] sm:$0x3]  ;;  %s3199_s25 = smul.u32 96, %s3671_s12  ;;  %vm468_vm3 = vcmask 31744  }
  0x12   : > { %3282 = vmatpush3.bf16.msra.mxu1 %v495_v2  ;;  %3354 = vmatpush3.bf16.msra.mxu0 %v3751_v3  ;;  %s4686_s13 = smov (!%p193_p5, %s3675_s13), 1  ;;  %v3071_v5 = vld [vmem:[%s4650_s1 + $0xa] sm:$0x3]  ;;  %vm247_vm1 = vsmask.f32 3328  ;;  %v3793_v17 = vsel %vm493_vm0, %v238_v4, 0 }
  0x13   : > { %3574 = vmatprep.subr.msk.bf16.mxu1 %vm493_vm0, %v238_v4  ;;  %s3583_s28 = smul.u32 216, %s4686_s13  ;;  %3579 = vmatprep.subr.msk.bf16.mxu0 %vm493_vm0, %v3071_v5  ;;  %vm248_vm2 = vsmask.f32 7440  ;;  %v3799_v26 = vld [vmem:[%s4650_s1 + $0xc] sm:$0x3]  ;;  %v3816_v37 = vsel %vm493_vm0, %v3071_v5, 0 }
  0x14   : > { %vm3808_vm4 = vmor %vm247_vm1, %vm248_vm2  ;;  %v3820_v41 = vsel %vm493_vm0, %v3799_v26, 0  ;;  %vm782_vm5 = vcmask 1042432   ;;  %vm783_vm6 = vcmask 1046532   ;;  %s2914_s27 = sshll.u32 %s4686_s13, 5  ;;  %p211_p7 = scmp.lt.s32.totalorder %s3671_s12, 1 }
  0x15   : > { %s197_s4 = scalar_lea.vmem %s4649_s0, %s3583_s28  ;;  %vm3963_vm7 = vmor %vm782_vm5, %vm783_vm6  ;;  %s2916_s6 = sshll.u32 %s4686_s13, 1 }
  0x16   : > { %s3769_s5 = scalar_lea.vmem %s197_s4, %s3199_s25  ;;  %s2912_s25 = sshll.u32 %s3671_s12, 3 }
  0x17   : > { %v3772_v6 = vld [vmem:[%s3769_s5] sm:$0xf]  ;;  %v3775_v7 = vld [vmem:[%s3769_s5 + $0x4] sm:$0xf]  ;;  %v3778_v8 = vld [vmem:[%s3769_s5 + $0x8] sm:$0x1] }
  0x18   : > { %v251_v9 = vshrl.u32 %v3772_v6, 16  ;;  %v254_v10 = vshll.u32 %v3772_v6, 16  ;;  %v260_v11 = vshll.u32 %v3775_v7, 16  ;;  %v264_v12 = vshrl.u32 %v3775_v7, 16  ;;  %v3014_v13 = vld [vmem:[%s3769_s5 + $0xc] sm:$0xf] }
  0x19   : > { %v270_v14 = vshll.u32 %v3778_v8, 16  ;;  %v3787_v15 = vld [vmem:[%s3769_s5 + $0x10] sm:$0xf]  ;;  %v3790_v16 = vld [vmem:[%s3769_s5 + $0x14] sm:$0x1]  ;;  %v1234_v23 = vshrl.u32 %v3014_v13, 16 }
  0x1a   : > { %v253_v18 = vrot.slane %v251_v9, 4  ;;  %v256_v19 = vrot.slane %v254_v10, 5  ;;  %v262_v20 = vrot.slane %v260_v11, 5  ;;  %v266_v21 = vrot.slane %v264_v12, 4  ;;  %v3804_v31 = vld [vmem:[%s3769_s5 + $0xc] sm:$0xf] }
  0x1b   : > { %v272_v22 = vrot.slane %v270_v14, 5  ;;  %v1237_v24 = vshll.u32 %v3014_v13, 16  ;;  %v1243_v25 = vshll.u32 %v3787_v15, 16  ;;  %v1247_v29 = vshrl.u32 %v3787_v15, 16  ;;  %v3813_v36 = vld [vmem:[%s3769_s5 + $0x10] sm:$0xf] }
  0x1c   : > { %v257_v27 = vor.u32 %v256_v19, %v253_v18  ;;  %v267_v28 = vor.u32 %v266_v21, %v262_v20  ;;  %v1253_v30 = vshll.u32 %v3790_v16, 16  ;;  %v1236_v33 = vrot.slane %v1234_v23, 4  ;;  %v3823_v44 = vld [vmem:[%s3769_s5 + $0x14] sm:$0x1]  ;;  %v3017_v55 = vld [vmem:[%s3769_s5 + $0x18] sm:$0xf] }
  0x1d   : > { %v1239_v34 = vrot.slane %v1237_v24, 5  ;;  %v1245_v35 = vrot.slane %v1243_v25, 5  ;;  %v1249_v40 = vrot.slane %v1247_v29, 4  ;;  %v275_v45 = vshrl.u32 %v3804_v31, 16  ;;  %v3836_v60 = vld [vmem:[%s3769_s5 + $0x1c] sm:$0xf] }
  0x1e   : > { %v258_v38 = vrot.slane %v257_v27, 4  ;;  %v268_v39 = vrot.slane %v267_v28, 4  ;;  %v1255_v43 = vrot.slane %v1253_v30, 5  ;;  %v278_v46 = vshll.u32 %v3804_v31, 16  ;;  %v3844_v1 = vld [vmem:[%s3769_s5 + $0x20] sm:$0x1] }
  0x1f   : > { %v1240_v42 = vor.u32 %v1239_v34, %v1236_v33  ;;  %v1250_v49 = vor.u32 %v1249_v40, %v1245_v35  ;;  %v284_v50 = vshll.u32 %v3813_v36, 16  ;;  %v277_v53 = vrot.slane %v275_v45, 4  ;;  %v3852_v21 = vld [vmem:[%s3769_s5 + $0x18] sm:$0xf]  ;;  %v3859_v27 = vld [vmem:[%s3769_s5 + $0x1c] sm:$0xf] }
  0x20   : > { %v263_v47 = vsel %vm3808_vm4, %v258_v38, %v262_v20  ;;  %v273_v48 = vsel %vm3808_vm4, %v268_v39, %v272_v22  ;;  %v280_v54 = vrot.slane %v278_v46, 5  ;;  %v288_v58 = vshrl.u32 %v3813_v36, 16  ;;  %v3867_v38 = vld [vmem:[%s3769_s5 + $0x20] sm:$0x1]  ;;  %p201_p6 = scmp.lt.s32.totalorder %s2912_s25, 15  ;;  %s4690_s12 = smov (!%p211_p7, %s3671_s12), 1 }
  0x21   : > { %v2922_v51 = vcombine.low %v263_v47, %v273_v48  ;;  %v1241_v52 = vrot.slane %v1240_v42, 4  ;;  %v1251_v56 = vrot.slane %v1250_v49, 4  ;;  %v286_v57 = vrot.slane %v284_v50, 5  ;;  %v3020_v47 = vld [vmem:[%s3769_s5 + $0x24] sm:$0xf]  ;;  %s214_s7 = sadd.s32 %s2916_s6, %s4690_s12 }
  0x22   : > { %v294_v59 = vshll.u32 %v3823_v44, 16  ;;  %v1625_v62 = vrot.slane %v3787_v15, 5  ;;  %v1628_v63 = vrot.slane %v3790_v16, 5  ;;  %v281_v0 = vor.u32 %v280_v54, %v277_v53  ;;  %s4688_s25 = smov (!%p201_p6, %s2912_s25), 15  ;;  %s2917_s8 = sshll.u32 %s214_s7, 1 }
  0x23   : > { %3283 = vmatprep.mubr.msk.bf16.mxu1 %vm468_vm3, %v2922_v51  ;;  %v1246_v61 = vsel %vm3808_vm4, %v1241_v52, %v1245_v35  ;;  %v1256_v2 = vsel %vm3808_vm4, %v1251_v56, %v1255_v43  ;;  %v290_v4 = vrot.slane %v288_v58, 4  ;;  %v1258_v9 = vshrl.u32 %v3017_v55, 16  ;;  %v3877_v52 = vld [vmem:[%s3769_s5 + $0x28] sm:$0xf]  ;;  %s2913_s26 = sshll.u32 %s4688_s25, 1  ;;  %s216_s11 = scalar_lea.vmem %s4652_s3, %s2917_s8 }
  0x24   : > { %v296_v5 = vrot.slane %v294_v59, 5  ;;  %v3039_v10 = vcombine.low %v1246_v61, %v1256_v2  ;;  %v282_v11 = vrot.slane %v281_v0, 4  ;;  %v1261_v12 = vshll.u32 %v3017_v55, 16  ;;  %v3889_v61 = vld [vmem:[%s3769_s5 + $0x2c] sm:$0x1]  ;;  %s205_s28 = sadd.s32 %s2914_s27, %s2913_s26 }
  0x25   : > { %v1267_v13 = vshll.u32 %v3836_v60, 16  ;;  %v291_v14 = vor.u32 %v290_v4, %v286_v57  ;;  %v1260_v18 = vrot.slane %v1258_v9, 4  ;;  %v1271_v19 = vshrl.u32 %v3836_v60, 16  ;;  %s2915_s29 = sshll.u32 %s205_s28, 3 }
  0x26   : > { %v1277_v20 = vshll.u32 %v3844_v1, 16  ;;  %3355 = vmatprep.mubr.msk.bf16.mxu0 %vm468_vm3, %v3039_v10  ;;  %v287_v22 = vsel %vm3808_vm4, %v282_v11, %v286_v57  ;;  %v1263_v23 = vrot.slane %v1261_v12, 5  ;;  %v1632_v25 = vrot.slane %v3836_v60, 5  ;;  %v3883_v57 = vld [vmem:[%s4650_s1 + $0x4] sm:$0x3] }
  0x27   : > { %v1269_v24 = vrot.slane %v1267_v13, 5  ;;  %v292_v28 = vrot.slane %v291_v14, 4  ;;  %v1273_v29 = vrot.slane %v1271_v19, 4  ;;  %v1635_v33 = vrot.slane %v3844_v1, 5  ;;  %v3896_v11 = vld [vmem:[%s3769_s5 + $0x24] sm:$0xf] }
  0x28   : > { %v1279_v30 = vrot.slane %v1277_v20, 5  ;;  %v1264_v34 = vor.u32 %v1263_v23, %v1260_v18  ;;  %v3864_v35 = vrot.slane %v1632_v25, 4  ;;  %v299_v39 = vshrl.u32 %v3852_v21, 16  ;;  %v3899_v19 = vld [vmem:[%s3769_s5 + $0x28] sm:$0xf] }
  0x29   : > { %v302_v40 = vshll.u32 %v3852_v21, 16  ;;  %v297_v42 = vsel %vm3808_vm4, %v292_v28, %v296_v5  ;;  %v1274_v43 = vor.u32 %v1273_v29, %v1269_v24  ;;  %v308_v45 = vshll.u32 %v3859_v27, 16  ;;  %v3909_v29 = vld [vmem:[%s3769_s5 + $0x2c] sm:$0x1] }
  0x2a   : > { %v312_v46 = vshrl.u32 %v3859_v27, 16  ;;  %v2923_v48 = vcombine.low %v287_v22, %v297_v42  ;;  %v1265_v49 = vrot.slane %v1264_v34, 4  ;;  %v301_v50 = vrot.slane %v299_v39, 4 }
  0x2b   : > { %v304_v51 = vrot.slane %v302_v40, 5  ;;  %v1275_v53 = vrot.slane %v1274_v43, 4  ;;  %v310_v54 = vrot.slane %v308_v45, 5  ;;  %v318_v56 = vshll.u32 %v3867_v38, 16  ;;  %v3023_v45 = vld [vmem:[%s3769_s5 + $0x30] sm:$0xf] }
  0x2c   : > { %v314_v55 = vrot.slane %v312_v46, 4  ;;  %3284 = vmatmul.mubr.msk.bf16.vlgmr.msra.gmra.mrb[0].mxu1 %vm468_vm3, %v2923_v48  ;;  %v1270_v58 = vsel %vm3808_vm4, %v1265_v49, %v1269_v24  ;;  %v1282_v0 = vshrl.u32 %v3020_v47, 16  ;;  %v1285_v2 = vshll.u32 %v3020_v47, 16 }
  0x2d   : > { %v305_v59 = vor.u32 %v304_v51, %v301_v50  ;;  %3300 = vmatpush3.bf16.msra.mxu1 %v3793_v17  ;;  %v1280_v4 = vsel %vm3808_vm4, %v1275_v53, %v1279_v30  ;;  %v320_v9 = vrot.slane %v318_v56, 5  ;;  %v1291_v10 = vshll.u32 %v3877_v52, 16  ;;  %v3919_v50 = vld [vmem:[%s3769_s5 + $0x34] sm:$0xf] }
  0x2e   : > { %v315_v5 = vor.u32 %v314_v55, %v310_v54  ;;  %v3040_v12 = vcombine.low %v1270_v58, %v1280_v4  ;;  %v1284_v14 = vrot.slane %v1282_v0, 4  ;;  %v1287_v18 = vrot.slane %v1285_v2, 5  ;;  %3575 = vmatprep.subr.msk.bf16.mxu1 %vm493_vm0, %v3883_v57  ;;  %v3929_v58 = vld [vmem:[%s3769_s5 + $0x38] sm:$0x1] }
  0x2f   : > { %v306_v13 = vrot.slane %v305_v59, 4  ;;  %v1293_v20 = vrot.slane %v1291_v10, 5  ;;  %v1295_v22 = vshrl.u32 %v3877_v52, 16  ;;  %v1301_v23 = vshll.u32 %v3889_v61, 16 }
  0x30   : > { %v316_v17 = vrot.slane %v315_v5, 4  ;;  %3356 = vmatmul.mubr.msk.bf16.vlgmr.msra.gmra.mrb[0].mxu0 %vm468_vm3, %v3040_v12  ;;  %v1288_v28 = vor.u32 %v1287_v18, %v1284_v14  ;;  %v323_v30 = vshrl.u32 %v3896_v11, 16  ;;  %v326_v34 = vshll.u32 %v3896_v11, 16  ;;  %v3934_v14 = vld [vmem:[%s3769_s5 + $0x30] sm:$0xf] }
  0x31   : > { %v311_v24 = vsel %vm3808_vm4, %v306_v13, %v310_v54  ;;  %3372 = vmatpush3.bf16.msra.mxu0 %v3816_v37  ;;  %v1297_v40 = vrot.slane %v1295_v22, 4  ;;  %v1303_v42 = vrot.slane %v1301_v23, 5  ;;  %v332_v43 = vshll.u32 %v3899_v19, 16  ;;  %v3940_v23 = vld [vmem:[%s3769_s5 + $0x34] sm:$0xf] }
  0x32   : > { %v321_v39 = vsel %vm3808_vm4, %v316_v17, %v320_v9  ;;  %v1289_v47 = vrot.slane %v1288_v28, 4  ;;  %v325_v48 = vrot.slane %v323_v30, 4  ;;  %v328_v49 = vrot.slane %v326_v34, 5  ;;  %3580 = vmatprep.subr.msk.bf16.mxu0 %vm493_vm0, %v3799_v26 }
  0x33   : > { %v2924_v46 = vcombine.low %v311_v24, %v321_v39  ;;  %v1298_v37 = vor.u32 %v1297_v40, %v1293_v20  ;;  %v334_v51 = vrot.slane %v332_v43, 5  ;;  %v336_v53 = vshrl.u32 %v3899_v19, 16  ;;  %v3945_v39 = vld [vmem:[%s3769_s5 + $0x38] sm:$0x1] }
  0x34   : > { %v342_v54 = vshll.u32 %v3909_v29, 16  ;;  %v1294_v55 = vsel %vm3808_vm4, %v1289_v47, %v1293_v20  ;;  %v329_v56 = vor.u32 %v328_v49, %v325_v48  ;;  %v1306_v59 = vshrl.u32 %v3023_v45, 16 }
  0x35   : > { %3287 = vmatprep.mubr.msk.bf16.mxu1 %vm468_vm3, %v2924_v46  ;;  %v1309_v0 = vshll.u32 %v3023_v45, 16  ;;  %v1299_v2 = vrot.slane %v1298_v37, 4  ;;  %v338_v26 = vrot.slane %v336_v53, 4  ;;  %v1315_v5 = vshll.u32 %v3919_v50, 16  ;;  %v3055_v37 = vld [vmem:[%s3769_s5 + $0xc] sm:$0xe] }
  0x36   : > { %v344_v4 = vrot.slane %v342_v54, 5  ;;  %v330_v9 = vrot.slane %v329_v56, 4  ;;  %v1308_v10 = vrot.slane %v1306_v59, 4  ;;  %v1319_v13 = vshrl.u32 %v3919_v50, 16  ;;  %v3957_v56 = vld [vmem:[%s3769_s5 + $0x3c] sm:$0xf] }
  0x37   : > { %v1311_v12 = vrot.slane %v1309_v0, 5  ;;  %v1304_v18 = vsel %vm3808_vm4, %v1299_v2, %v1303_v42  ;;  %v339_v17 = vor.u32 %v338_v26, %v334_v51  ;;  %v1317_v20 = vrot.slane %v1315_v5, 5 }
  0x38   : > { %v1325_v22 = vshll.u32 %v3929_v58, 16  ;;  %v3041_v24 = vcombine.low %v1294_v55, %v1304_v18  ;;  %v335_v28 = vsel %vm3808_vm4, %v330_v9, %v334_v51  ;;  %v1321_v34 = vrot.slane %v1319_v13, 4  ;;  %v3971_v18 = vld [vmem:[%s3769_s5 + $0x44] sm:$0x1] }
  0x39   : > { %v1312_v30 = vor.u32 %v1311_v12, %v1308_v10  ;;  %v340_v40 = vrot.slane %v339_v17, 4  ;;  %v347_v42 = vshrl.u32 %v3934_v14, 16  ;;  %v350_v45 = vshll.u32 %v3934_v14, 16  ;;  %v3056_v17 = vld [vmem:[%s3769_s5 + $0x18] sm:$0xe] }
  0x3a   : > { %v1327_v43 = vrot.slane %v1325_v22, 5  ;;  %3359 = vmatprep.mubr.msk.bf16.mxu0 %vm468_vm3, %v3041_v24  ;;  %v1322_v47 = vor.u32 %v1321_v34, %v1317_v20  ;;  %v356_v48 = vshll.u32 %v3940_v23, 16  ;;  %v360_v49 = vshrl.u32 %v3940_v23, 16 }
  0x3b   : > { %v1313_v46 = vrot.slane %v1312_v30, 4  ;;  %v345_v51 = vsel %vm3808_vm4, %v340_v40, %v344_v4  ;;  %v349_v53 = vrot.slane %v347_v42, 4  ;;  %v352_v54 = vrot.slane %v350_v45, 5  ;;  %v3968_v4 = vld [vmem:[%s3769_s5 + $0x40] sm:$0xf] }
  0x3c   : > { %v366_v55 = vshll.u32 %v3945_v39, 16  ;;  %v2925_v59 = vcombine.low %v335_v28, %v345_v51  ;;  %v1323_v2 = vrot.slane %v1322_v47, 4  ;;  %v358_v26 = vrot.slane %v356_v48, 5  ;;  %v3982_v30 = vld [vmem:[%s3769_s5 + $0x48] sm:$0xf] }
  0x3d   : > { %v1318_v0 = vsel %vm3808_vm4, %v1313_v46, %v1317_v20  ;;  %v353_v9 = vor.u32 %v352_v54, %v349_v53  ;;  %v362_v10 = vrot.slane %v360_v49, 4  ;;  %v3063_v13 = vrot.slane %v3055_v37, 9 }
  0x3e   : > { %v368_v12 = vrot.slane %v366_v55, 5  ;;  %3288 = vmatmul.mubr.msk.bf16.gmra.mrb[4].mxu1 %vm468_vm3, %v2925_v59  ;;  %v1328_v20 = vsel %vm3808_vm4, %v1323_v2, %v1327_v43  ;;  %v1627_v22 = vrot.slane %v1625_v62, 4  ;;  %v371_v24 = vshrl.u32 %v3957_v56, 16  ;;  %v4002_v55 = vld [vmem:[%s3769_s5 + $0x50] sm:$0x1] }
  0x3f   : > { %v374_v28 = vshll.u32 %v3957_v56, 16  ;;  %v3042_v34 = vcombine.low %v1318_v0, %v1328_v20  ;;  %v354_v40 = vrot.slane %v353_v9, 4  ;;  %v363_v42 = vor.u32 %v362_v10, %v358_v26 }
  0x40   : > { %v1626_v45 = vsel %vm3963_vm7, %v3063_v13, %v1625_v62  ;;  %v1629_v43 = vsel %vm3963_vm7, %v1627_v22, %v1628_v63  ;;  %v373_v46 = vrot.slane %v371_v24, 4  ;;  %v380_v48 = vshll.u32 %v3968_v4, 16  ;;  %v3998_v62 = vld [vmem:[%s3769_s5 + $0x4c] sm:$0xf] }
  0x41   : > { %v376_v47 = vrot.slane %v374_v28, 5  ;;  %3360 = vmatmul.mubr.msk.bf16.gmra.mrb[4].mxu0 %vm468_vm3, %v3042_v34  ;;  %v359_v49 = vsel %vm3808_vm4, %v354_v40, %v358_v26  ;;  %v364_v37 = vrot.slane %v363_v42, 4  ;;  %v3072_v15 = vcombine.low %v1626_v45, %v1629_v43  ;;  %v4020_v28 = vld [vmem:[%s3769_s5 + $0x54] sm:$0xf]  ;;  %v4031_v34 = vld [vmem:[%s4650_s1 + $0xe] sm:$0x3] }
  0x42   : > { %v384_v51 = vshrl.u32 %v3968_v4, 16  ;;  %v382_v53 = vrot.slane %v380_v48, 5  ;;  %v390_v63 = vshll.u32 %v3971_v18, 16  ;;  %v3064_v54 = vrot.slane %v3056_v17, 9 }
  0x43   : > { %v377_v16 = vor.u32 %v376_v47, %v373_v46  ;;  %v369_v59 = vsel %vm3808_vm4, %v364_v37, %v368_v12  ;;  %3373 = vmatprep.mubr.msk.bf16.mxu0 %vm468_vm3, %v3072_v15  ;;  %v1636_v2 = vsel %vm3963_vm7, %v3864_v35, %v1635_v33  ;;  %v395_v26 = vshrl.u32 %v3982_v30, 16  ;;  %v3057_v12 = vld [vmem:[%s3769_s5 + $0x24] sm:$0xe]  ;;  %v4036_v37 = vld [vmem:[%s3769_s5 + $0x58] sm:$0xf] }
  0x44   : > { %v386_v0 = vrot.slane %v384_v51, 4  ;;  %v2926_v9 = vcombine.low %v359_v49, %v369_v59  ;;  %v392_v13 = vrot.slane %v390_v63, 5  ;;  %v1633_v17 = vsel %vm3963_vm7, %v3064_v54, %v1632_v25  ;;  %v4045_v54 = vld [vmem:[%s3769_s5 + $0x5c] sm:$0x1] }
  0x45   : > { %v378_v10 = vrot.slane %v377_v16, 4  ;;  %v3073_v22 = vcombine.low %v1633_v17, %v1636_v2  ;;  %v397_v24 = vrot.slane %v395_v26, 4  ;;  %v398_v1 = vshll.u32 %v3982_v30, 16 }
  0x46   : > { %v387_v20 = vor.u32 %v386_v0, %v382_v53  ;;  %3291 = vmatprep.mubr.msk.bf16.mxu1 %vm468_vm3, %v2926_v9  ;;  %v404_v35 = vshll.u32 %v3998_v62, 16  ;;  %v408_v60 = vshrl.u32 %v3998_v62, 16  ;;  %v414_v25 = vshll.u32 %v4002_v55, 16 }
  0x47   : > { %v383_v33 = vsel %vm3808_vm4, %v378_v10, %v382_v53  ;;  %v400_v42 = vrot.slane %v398_v1, 5  ;;  %v3065_v45 = vrot.slane %v3057_v12, 9  ;;  %v1639_v43 = vrot.slane %v3877_v52, 5  ;;  %v3058_v10 = vld [vmem:[%s3769_s5 + $0x30] sm:$0xe] }
  0x48   : > { %v388_v40 = vrot.slane %v387_v20, 4  ;;  %v406_v46 = vrot.slane %v404_v35, 5  ;;  %v410_v47 = vrot.slane %v408_v60, 4  ;;  %v416_v48 = vrot.slane %v414_v25, 5 }
  0x49   : > { %v1642_v49 = vrot.slane %v3889_v61, 5  ;;  %3374 = vmatmul.mubr.msk.bf16.vlgmr.msra.gmra.mrb[0].mxu0 %vm468_vm3, %v3073_v22  ;;  %v401_v51 = vor.u32 %v400_v42, %v397_v24  ;;  %v1640_v16 = vsel %vm3963_vm7, %v3065_v45, %v1639_v43  ;;  %v1641_v53 = vrot.slane %v1639_v43, 4  ;;  %v4066_v42 = vld [vmem:[%s3769_s5 + $0x40] sm:$0xf]  ;;  %v4069_v45 = vld [vmem:[%s3769_s5 + $0x44] sm:$0x1] }
  0x4a   : > { %v393_v15 = vsel %vm3808_vm4, %v388_v40, %v392_v13  ;;  %3390 = vmatpush3.bf16.msra.mxu0 %v3820_v41  ;;  %v411_v52 = vor.u32 %v410_v47, %v406_v46  ;;  %v419_v61 = vshrl.u32 %v4020_v28, 16  ;;  %v422_v59 = vshll.u32 %v4020_v28, 16 }
  0x4b   : > { %v2927_v63 = vcombine.low %v383_v33, %v393_v15  ;;  %v402_v0 = vrot.slane %v401_v51, 4  ;;  %v1643_v2 = vsel %vm3963_vm7, %v1641_v53, %v1642_v49  ;;  %v428_v26 = vshll.u32 %v4036_v37, 16  ;;  %3581 = vmatprep.subr.msk.bf16.mxu0 %vm493_vm0, %v4031_v34  ;;  %v3059_v33 = vld [vmem:[%s3769_s5 + $0x3c] sm:$0xe] }
  0x4c   : > { %v432_v9 = vshrl.u32 %v4036_v37, 16  ;;  %v412_v41 = vrot.slane %v411_v52, 4  ;;  %v3074_v13 = vcombine.low %v1640_v16, %v1643_v2  ;;  %v421_v17 = vrot.slane %v419_v61, 4  ;;  %v3060_v2 = vld [vmem:[%s3769_s5 + $0x48] sm:$0xe] }
  0x4d   : > { %3292 = vmatmul.mubr.msk.bf16.gmra.mrb[8].mxu1 %vm468_vm3, %v2927_v63  ;;  %v424_v12 = vrot.slane %v422_v59, 5  ;;  %v407_v20 = vsel %vm3808_vm4, %v402_v0, %v406_v46  ;;  %v430_v22 = vrot.slane %v428_v26, 5  ;;  %v438_v1 = vshll.u32 %v4045_v54, 16  ;;  %v4084_v59 = vld [vmem:[%s3769_s5 + $0x4c] sm:$0xf] }
  0x4e   : > { %v434_v24 = vrot.slane %v432_v9, 4  ;;  %v417_v35 = vsel %vm3808_vm4, %v412_v41, %v416_v48  ;;  %3377 = vmatprep.mubr.msk.bf16.mxu0 %vm468_vm3, %v3074_v13  ;;  %v3066_v25 = vrot.slane %v3058_v10, 9  ;;  %v1646_v40 = vrot.slane %v3919_v50, 5  ;;  %v4087_v0 = vld [vmem:[%s3769_s5 + $0x50] sm:$0x1] }
  0x4f   : > { %v425_v60 = vor.u32 %v424_v12, %v421_v17  ;;  %v2928_v43 = vcombine.low %v407_v20, %v417_v35  ;;  %v440_v47 = vrot.slane %v438_v1, 5  ;;  %v1649_v49 = vrot.slane %v3929_v58, 5  ;;  %v4095_v17 = vld [vmem:[%s3769_s5 + $0x58] sm:$0xf]  ;;  %v4098_v12 = vld [vmem:[%s3769_s5 + $0x5c] sm:$0x1] }
  0x50   : > { %v435_v46 = vor.u32 %v434_v24, %v430_v22  ;;  %v1647_v48 = vsel %vm3963_vm7, %v3066_v25, %v1646_v40  ;;  %v1648_v51 = vrot.slane %v1646_v40, 4  ;;  %v3067_v16 = vrot.slane %v3059_v33, 9  ;;  %4662 = vst [vmem:[#allocation2_spill] sm:$0xff] %v4098_v12  ;;  %v4108_v35 = vld [vmem:[%s3769_s5 + $0x64] sm:$0xf] }
  0x51   : > { %v426_v15 = vrot.slane %v425_v60, 4  ;;  %3295 = vmatprep.mubr.msk.bf16.mxu1 %vm468_vm3, %v2928_v43  ;;  %v1653_v53 = vrot.slane %v4066_v42, 5  ;;  %v1656_v63 = vrot.slane %v4069_v45, 5  ;;  %v2938_v61 = vcombine.low %v3772_v6, %v3775_v7  ;;  %v3061_v6 = vld [vmem:[%s3769_s5 + $0x54] sm:$0xe]  ;;  %4663 = vst [vmem:[#allocation3_spill] sm:$0xff] %v4108_v35 }
  0x52   : > { %v436_v50 = vrot.slane %v435_v46, 4  ;;  %v1650_v58 = vsel %vm3963_vm7, %v1648_v51, %v1649_v49  ;;  %v1660_v24 = vrot.slane %v4084_v59, 5  ;;  %v1663_v1 = vrot.slane %v4087_v0, 5  ;;  %v4111_v60 = vld [vmem:[%s3769_s5 + $0x68] sm:$0x1] }
  0x53   : > { %v431_v52 = vsel %vm3808_vm4, %v426_v15, %v430_v22  ;;  %v3075_v9 = vcombine.low %v1647_v48, %v1650_v58  ;;  %v1654_v10 = vsel %vm3963_vm7, %v3067_v16, %v1653_v53  ;;  %v1655_v41 = vrot.slane %v1653_v53, 4  ;;  %4664 = vst [vmem:[#allocation4_spill] sm:$0xff] %v4111_v60 }
  0x54   : > { %v441_v26 = vsel %vm3808_vm4, %v436_v50, %v440_v47  ;;  %v3068_v22 = vrot.slane %v3060_v2, 9  ;;  %v1662_v40 = vrot.slane %v1660_v24, 4  ;;  %v3069_v43 = vrot.slane %v3061_v6, 9  ;;  %v3062_v47 = vld [vmem:[%s3769_s5 + $0x60] sm:$0xe] }
  0x55   : > { %v2929_v13 = vcombine.low %v431_v52, %v441_v26  ;;  %3378 = vmatmul.mubr.msk.bf16.gmra.mrb[4].mxu0 %vm468_vm3, %v3075_v9  ;;  %v1657_v20 = vsel %vm3963_vm7, %v1655_v41, %v1656_v63  ;;  %v1667_v46 = vrot.slane %v4095_v17, 5  ;;  %v794_v49 = vrot.slane %v3813_v36, 5  ;;  %v760_v2 = vld [vmem:[%s3769_s5 + $0x18] sm:$0xe]  ;;  %v4143_v6 = vld [vmem:[%s4650_s1 + $0x6] sm:$0x3] }
  0x56   : > { %v3076_v33 = vcombine.low %v1654_v10, %v1657_v20  ;;  %v1661_v25 = vsel %vm3963_vm7, %v3068_v22, %v1660_v24  ;;  %v1670_v15 = vrot.slane %v4098_v12, 5  ;;  %v1664_v48 = vsel %vm3963_vm7, %v1662_v40, %v1663_v1  ;;  %v762_v1 = vld [vmem:[%s3769_s5 + $0x30] sm:$0xe] }
  0x57   : > { %3296 = vmatmul.mubr.msk.bf16.gmra.mrb[12].mxu1 %vm468_vm3, %v2929_v13  ;;  %v1668_v51 = vsel %vm3963_vm7, %v3069_v43, %v1667_v46  ;;  %v1669_v16 = vrot.slane %v1667_v46, 4  ;;  %v1674_v50 = vrot.slane %v4108_v35, 5  ;;  %v2939_v53 = vcombine.low %v3804_v31, %v3813_v36  ;;  %v761_v36 = vld [vmem:[%s3769_s5 + $0x24] sm:$0xe]  ;;  %v4417_v12 = vld [vmem:[%s3769_s5 + $0x70] sm:$0xf] }
  0x58   : > { %3301 = vmatprep.mubr.msk.bf16.mxu1 %vm468_vm3, %v2938_v61  ;;  %3381 = vmatprep.mubr.msk.bf16.mxu0 %vm468_vm3, %v3076_v33  ;;  %v3077_v63 = vcombine.low %v1661_v25, %v1664_v48  ;;  %v3070_v52 = vrot.slane %v3062_v47, 9  ;;  %v1677_v58 = vrot.slane %v4111_v60, 5  ;;  %v759_v61 = vld [vmem:[%s3769_s5 + $0xc] sm:$0xe]  ;;  %v797_v26 = vrot.slane %v3823_v44, 5 }
  0x59   : > { %v2940_v9 = vcombine.low %v3852_v21, %v3859_v27  ;;  %v1671_v10 = vsel %vm3963_vm7, %v1669_v16, %v1670_v15  ;;  %v1676_v41 = vrot.slane %v1674_v50, 4  ;;  %v892_v13 = vsel %vm493_vm0, %v3883_v57, 0  ;;  %v3629_v16 = vld [vmem:[%s3769_s5 + $0x18] sm:$0xff]   ;;  %v4389_v60 = vld [vmem:[%s3769_s5 + $0x64] sm:$0xf] }
  0x5a   : > { %v3078_v31 = vcombine.low %v1668_v51, %v1671_v10  ;;  %v2955_v44 = vrot.slane %v759_v61, 9  ;;  %v796_v20 = vrot.slane %v794_v49, 4  ;;  %v2956_v21 = vrot.slane %v760_v2, 9  ;;  %4665 = vst [vmem:[#allocation5_spill] sm:$0xff] %v4389_v60 }
  0x5b   : > { %v1675_v22 = vsel %vm3963_vm7, %v3070_v52, %v1674_v50  ;;  %v1678_v57 = vsel %vm3963_vm7, %v1676_v41, %v1677_v58  ;;  %v801_v24 = vrot.slane %v3859_v27, 5  ;;  %v804_v40 = vrot.slane %v3867_v38, 5 }
  0x5c   : > { %v4156_v33 = vsel %vm3963_vm7, %v2955_v44, %v794_v49  ;;  %v4160_v25 = vsel %vm3963_vm7, %v796_v20, %v797_v26  ;;  %v2957_v43 = vrot.slane %v761_v36, 9  ;;  %v3079_v49 = vcombine.low %v1675_v22, %v1678_v57  ;;  %v3123_v26 = vld [vmem:[%s3769_s5 + $0x18] sm:$0xf]  ;;  %v3631_v57 = vld [vmem:[%s3769_s5 + $0x24] sm:$0xff]  }
  0x5d   : > { %3382 = vmatmul.mubr.msk.bf16.gmra.mrb[8].mxu0 %vm468_vm3, %v3077_v63  ;;  %v2964_v27 = vcombine.low %v4156_v33, %v4160_v25  ;;  %v4169_v46 = vsel %vm3963_vm7, %v2956_v21, %v801_v24  ;;  %v803_v47 = vrot.slane %v801_v24, 4  ;;  %v808_v15 = vrot.slane %v3899_v19, 5 }
  0x5e   : > { %3385 = vmatprep.mubr.msk.bf16.mxu0 %vm468_vm3, %v3078_v31  ;;  %v811_v48 = vrot.slane %v3909_v29, 5  ;;  %v2958_v38 = vrot.slane %v762_v1, 9  ;;  %v2941_v51 = vcombine.low %v3896_v11, %v3899_v19  ;;  %v818_v63 = vrot.slane %v3945_v39, 5  ;;  %v763_v19 = vld [vmem:[%s3769_s5 + $0x3c] sm:$0xe] }
  0x5f   : > { %3302 = vmatmul.mubr.msk.bf16.vlgmr.msra.gmra.mrb[0].mxu1 %vm468_vm3, %v2939_v53  ;;  %v4178_v50 = vsel %vm3963_vm7, %v803_v47, %v804_v40  ;;  %v815_v53 = vrot.slane %v3940_v23, 5  ;;  %v2942_v52 = vcombine.low %v3934_v14, %v3940_v23  ;;  %v4188_v58 = vsel %vm3963_vm7, %v2957_v43, %v808_v15  ;;  %v758_v14 = vld [vmem:[%s3769_s5] sm:$0xe]  ;;  %v4216_v31 = vld [vmem:[%s3769_s5 + $0x1c] sm:$0xf] }
  0x60   : > { %3318 = vmatpush3.bf16.msra.mxu1 %v892_v13  ;;  %3305 = vmatprep.mubr.msk.bf16.mxu1 %vm468_vm3, %v2940_v9  ;;  %v2965_v29 = vcombine.low %v4169_v46, %v4178_v50  ;;  %v810_v11 = vrot.slane %v808_v15, 4  ;;  %v787_v61 = vrot.slane %v3775_v7, 5  ;;  %v2959_v10 = vrot.slane %v763_v19, 9  ;;  %v764_v1 = vld [vmem:[%s3769_s5 + $0x48] sm:$0xe] }
  0x61   : > { %3576 = vmatprep.subr.msk.bf16.mxu1 %vm493_vm0, %v4143_v6  ;;  %v4194_v2 = vsel %vm3963_vm7, %v2958_v38, %v815_v53  ;;  %v817_v39 = vrot.slane %v815_v53, 4  ;;  %v790_v41 = vrot.slane %v3778_v8, 5  ;;  %v2954_v36 = vrot.slane %v758_v14, 9  ;;  %v4242_v38 = vld [vmem:[%s4650_s1 + $0x10] sm:$0x3] }
  0x62   : > { %v4200_v23 = vsel %vm3963_vm7, %v810_v11, %v811_v48  ;;  %v789_v44 = vrot.slane %v787_v61, 4  ;;  %v822_v20 = vrot.slane %v3968_v4, 5  ;;  %v825_v21 = vrot.slane %v3971_v18, 5  ;;  %v4263_v14 = vld [vmem:[%s3769_s5 + $0x28] sm:$0xf] }
  0x63   : > { %v4209_v9 = vsel %vm3963_vm7, %v817_v39, %v818_v63  ;;  %v2943_v22 = vcombine.low %v3957_v56, %v3968_v4  ;;  %v2072_v24 = vshrl.u32 %v3123_v26, 16  ;;  %v2075_v8 = vshll.u32 %v3123_v26, 16  ;;  %v3633_v4 = vld [vmem:[%s3769_s5 + $0x30] sm:$0xff]   ;;  %v4365_v46 = vld [vmem:[%s3769_s5 + $0x44] sm:$0x1] }
  0x64   : > { %v2081_v40 = vshll.u32 %v4216_v31, 16  ;;  %v2085_v43 = vshrl.u32 %v4216_v31, 16  ;;  %v4228_v47 = vsel %vm3963_vm7, %v2959_v10, %v822_v20  ;;  %v2314_v18 = vsel %vm493_vm0, %v4031_v34, 0  ;;  %v3141_v7 = vld [vmem:[%s3769_s5 + $0x60] sm:$0xf] }
  0x65   : > { %3386 = vmatmul.mubr.msk.bf16.gmra.mrb[12].mxu0 %vm468_vm3, %v3079_v49  ;;  %v824_v49 = vrot.slane %v822_v20, 4  ;;  %v2944_v56 = vcombine.low %v3982_v30, %v3998_v62  ;;  %v788_v15 = vsel %vm3963_vm7, %v2954_v36, %v787_v61  ;;  %v791_v48 = vsel %vm3963_vm7, %v789_v44, %v790_v41  ;;  %v4250_v30 = vld [vmem:[%s3769_s5 + $0x20] sm:$0x1]  ;;  %v3126_v61 = vld [vmem:[%s3769_s5 + $0x24] sm:$0xf] }
  0x66   : > { %3391 = vmatprep.mubr.msk.bf16.mxu0 %vm468_vm3, %v3629_v16  ;;  %v2960_v34 = vrot.slane %v764_v1, 9  ;;  %v2074_v16 = vrot.slane %v2072_v24, 4  ;;  %v2077_v53 = vrot.slane %v2075_v8, 5  ;;  %v4256_v11 = vrot.slane %v2081_v40, 5  ;;  %v765_v44 = vld [vmem:[%s3769_s5 + $0x54] sm:$0xe] }
  0x67   : > { %3306 = vmatmul.mubr.msk.bf16.gmra.mrb[4].mxu1 %vm468_vm3, %v2941_v51  ;;  %v4246_v51 = vsel %vm3963_vm7, %v824_v49, %v825_v21  ;;  %v2087_v19 = vrot.slane %v2085_v43, 4  ;;  %v832_v39 = vrot.slane %v4002_v55, 5  ;;  %v2945_v10 = vcombine.low %v4020_v28, %v4036_v37  ;;  %v3129_v55 = vld [vmem:[%s3769_s5 + $0x30] sm:$0xf]  ;;  %v3635_v20 = vld [vmem:[%s3769_s5 + $0x3c] sm:$0xff]   ;;  %v3636_v1 = vld [vmem:[%s3769_s5 + $0x48] sm:$0xff]  }
  0x68   : > { %3309 = vmatprep.mubr.msk.bf16.mxu1 %vm468_vm3, %v2942_v52  ;;  %v829_v52 = vrot.slane %v3998_v62, 5  ;;  %v2963_v41 = vcombine.low %v788_v15, %v791_v48  ;;  %v2091_v36 = vshll.u32 %v4250_v30, 16  ;;  %v2078_v21 = vor.u32 %v2077_v53, %v2074_v16  ;;  %v4282_v8 = vld [vmem:[%s3769_s5 + $0x34] sm:$0xf] }
  0x69   : > { %v2088_v28 = vor.u32 %v2087_v19, %v4256_v11  ;;  %v2105_v40 = vshll.u32 %v4263_v14, 16  ;;  %v2109_v43 = vshrl.u32 %v4263_v14, 16  ;;  %v836_v15 = vrot.slane %v4036_v37, 5 }
  0x6a   : > { %v4267_v62 = vsel %vm3963_vm7, %v2960_v34, %v829_v52  ;;  %v831_v26 = vrot.slane %v829_v52, 4  ;;  %v2129_v48 = vshll.u32 %v4282_v8, 16  ;;  %v2133_v34 = vshrl.u32 %v4282_v8, 16 }
  0x6b   : > { %v839_v16 = vrot.slane %v4045_v54, 5  ;;  %v2079_v53 = vrot.slane %v2078_v21, 4  ;;  %v2093_v52 = vrot.slane %v2091_v36, 5  ;;  %v2089_v37 = vrot.slane %v2088_v28, 4  ;;  %v4305_v36 = vld [vmem:[%s3769_s5 + $0x2c] sm:$0x1] }
  0x6c   : > { %v4279_v24 = vsel %vm3963_vm7, %v831_v26, %v832_v39  ;;  %v4301_v26 = vrot.slane %v2105_v40, 5  ;;  %v4312_v21 = vld [vmem:[%s3769_s5 + $0x38] sm:$0x1]  ;;  %v1094_v28 = vsel %vm493_vm0, %v4143_v6, 0 }
  0x6d   : > { %3392 = vmatmul.mubr.msk.bf16.vlgmr.msra.gmra.mrb[0].mxu0 %vm468_vm3, %v3631_v57  ;;  %v2099_v57 = vshll.u32 %v3126_v61, 16  ;;  %v3637_v40 = vld [vmem:[%s3769_s5 + $0x54] sm:$0xff]  }
  0x6e   : > { %3408 = vmatpush3.bf16.msra.mxu0 %v2314_v18  ;;  %3395 = vmatprep.mubr.msk.bf16.mxu0 %vm468_vm3, %v3633_v4  ;;  %v2120_v18 = vshrl.u32 %v3129_v55, 16  ;;  %v2961_v4 = vrot.slane %v765_v44, 9 }
  0x6f   : > { %3310 = vmatmul.mubr.msk.bf16.gmra.mrb[8].mxu1 %vm468_vm3, %v2943_v22  ;;  %3582 = vmatprep.subr.msk.bf16.mxu0 %vm493_vm0, %v4242_v38  ;;  %v2096_v22 = vshrl.u32 %v3126_v61, 16  ;;  %v838_v61 = vrot.slane %v836_v15, 4  ;;  %v2101_v54 = vrot.slane %v2099_v57, 5  ;;  %v2135_v57 = vrot.slane %v2133_v34, 4  ;;  %v3135_v34 = vld [vmem:[%s3769_s5 + $0x48] sm:$0xf] }
  0x70   : > { %3313 = vmatprep.mubr.msk.bf16.mxu1 %vm468_vm3, %v2944_v56  ;;  %v2123_v56 = vshll.u32 %v3129_v55, 16  ;;  %v4297_v19 = vsel %vm3963_vm7, %v2961_v4, %v836_v15  ;;  %v2111_v55 = vrot.slane %v2109_v43, 4  ;;  %v2122_v44 = vrot.slane %v2120_v18, 4  ;;  %v4323_v43 = vld [vmem:[%s3769_s5 + $0x40] sm:$0xf] }
  0x71   : > { %v2098_v39 = vrot.slane %v2096_v22, 4  ;;  %v4314_v22 = vrot.slane %v2129_v48, 5  ;;  %v3638_v18 = vld [vmem:[%s3769_s5 + $0x60] sm:$0xff]   ;;  %v2094_v4 = vsel %vm3808_vm4, %v2089_v37, %v2093_v52  ;;  %v2115_v48 = vshll.u32 %v4305_v36, 16 }
  0x72   : > { %v2168_v52 = vshrl.u32 %v3135_v34, 16  ;;  %v2171_v37 = vshll.u32 %v3135_v34, 16 }
  0x73   : > { %v2102_v15 = vor.u32 %v2101_v54, %v2098_v39  ;;  %v2136_v63 = vor.u32 %v2135_v57, %v4314_v22  ;;  %v3138_v57 = vld [vmem:[%s3769_s5 + $0x54] sm:$0xf] }
  0x74   : > { %v2170_v50 = vrot.slane %v2168_v52, 4  ;;  %v2195_v34 = vshll.u32 %v3138_v57, 16 }
  0x75   : > { %3396 = vmatmul.mubr.msk.bf16.gmra.mrb[4].mxu0 %vm468_vm3, %v3635_v20  ;;  %v2125_v20 = vrot.slane %v2123_v56, 5  ;;  %v2084_v56 = vsel %vm3808_vm4, %v2079_v53, %v4256_v11  ;;  %v2153_v11 = vshll.u32 %v4323_v43, 16  ;;  %v2157_v53 = vshrl.u32 %v4323_v43, 16 }
  0x76   : > { %3399 = vmatprep.mubr.msk.bf16.mxu0 %vm468_vm3, %v3636_v1  ;;  %v2139_v1 = vshll.u32 %v4312_v21, 16  ;;  %v3148_v54 = vcombine.low %v2084_v56, %v2094_v4  ;;  %v2137_v56 = vrot.slane %v2136_v63, 4  ;;  %v4370_v63 = vld [vmem:[%s3769_s5 + $0x50] sm:$0x1] }
  0x77   : > { %3314 = vmatmul.mubr.msk.bf16.gmra.mrb[12].mxu1 %vm468_vm3, %v2945_v10  ;;  %v4309_v10 = vsel %vm3963_vm7, %v838_v61, %v839_v16  ;;  %v4334_v16 = vld [vmem:[%s3769_s5 + $0x4c] sm:$0xf]  ;;  %v2112_v61 = vor.u32 %v2111_v55, %v4301_v26  ;;  %v2126_v6 = vor.u32 %v2125_v20, %v2122_v44  ;;  %v2103_v55 = vrot.slane %v2102_v15, 4 }
  0x78   : > { %3319 = vmatprep.mubr.msk.bf16.mxu1 %vm468_vm3, %v2963_v41  ;;  %v3132_v41 = vld [vmem:[%s3769_s5 + $0x3c] sm:$0xf]  ;;  %v2177_v39 = vshll.u32 %v4334_v16, 16  ;;  %v2117_v44 = vrot.slane %v2115_v48, 5  ;;  %v2181_v20 = vshrl.u32 %v4334_v16, 16  ;;  %v2141_v33 = vrot.slane %v2139_v1, 5 }
  0x79   : > { %v2144_v49 = vshrl.u32 %v3132_v41, 16  ;;  %v2147_v13 = vshll.u32 %v3132_v41, 16  ;;  %v2113_v41 = vrot.slane %v2112_v61, 4  ;;  %v4358_v15 = vrot.slane %v2153_v11, 5 }
  0x7a   : > { %v2159_v48 = vrot.slane %v2157_v53, 4  ;;  %v2192_v1 = vshrl.u32 %v3138_v57, 16  ;;  %v1363_v11 = vshll.u32 %v4084_v59, 16  ;;  %v2108_v53 = vsel %vm3808_vm4, %v2103_v55, %v4301_v26 }
  0x7b   : > { %v2146_v25 = vrot.slane %v2144_v49, 4  ;;  %v2149_v4 = vrot.slane %v2147_v13, 5  ;;  %v4367_v49 = vrot.slane %v2177_v39, 5  ;;  %v2183_v13 = vrot.slane %v2181_v20, 4 }
  0x7c   : > { %v2118_v52 = vsel %vm3808_vm4, %v2113_v41, %v2117_v44  ;;  %v2160_v57 = vor.u32 %v2159_v48, %v4358_v15  ;;  %v2142_v26 = vsel %vm3808_vm4, %v2137_v56, %v2141_v33  ;;  %v2194_v44 = vrot.slane %v2192_v1, 4  ;;  %v4408_v56 = vld [vmem:[%s3769_s5 + $0x5c] sm:$0x1] }
  0x7d   : > { %3400 = vmatmul.mubr.msk.bf16.gmra.mrb[8].mxu0 %vm468_vm3, %v3637_v40  ;;  %v2127_v40 = vrot.slane %v2126_v6, 4  ;;  %v2150_v20 = vor.u32 %v2149_v4, %v2146_v25  ;;  %v2184_v41 = vor.u32 %v2183_v13, %v4367_v49  ;;  %v4667_v33 = vcombine.low %v4194_v2, %v4209_v9 }
  0x7e   : > { %3403 = vmatprep.mubr.msk.bf16.mxu0 %vm468_vm3, %v3638_v18  ;;  %v3639_v18 = vld [vmem:[%s3769_s5 + $0x6c] sm:$0xff]   ;;  %v2216_v4 = vshrl.u32 %v3141_v7, 16  ;;  %v1367_v48 = vshrl.u32 %v4084_v59, 16  ;;  %v3149_v13 = vcombine.low %v2108_v53, %v2118_v52 }
  0x7f   : > { %3320 = vmatmul.mubr.msk.bf16.vlgmr.msra.gmra.mrb[0].mxu1 %vm468_vm3, %v2964_v27  ;;  %v4355_v27 = vld [vmem:[%s3769_s5 + $0x58] sm:$0xf]  ;;  %v2132_v39 = vsel %vm3808_vm4, %v2127_v40, %v4314_v22  ;;  %v4666_v22 = vcombine.low %v4188_v58, %v4200_v23  ;;  %v2197_v40 = vrot.slane %v2195_v34, 5  ;;  %v2219_v58 = vshll.u32 %v3141_v7, 16 }
  0x80   : > { %3336 = vmatpush3.bf16.msra.mxu1 %v1094_v28  ;;  %3323 = vmatprep.mubr.msk.bf16.mxu1 %vm468_vm3, %v2965_v29  ;;  %v3648_v28 = vld [vmem:[%s4650_s1 + $0x8] sm:$0x3]  ;;  %v2173_v29 = vrot.slane %v2171_v37, 5  ;;  %v2201_v61 = vshll.u32 %v4355_v27, 16  ;;  %v2205_v6 = vshrl.u32 %v4355_v27, 16  ;;  %v2568_v37 = vsel %vm493_vm0, %v4242_v38, 0 }
  0x81   : > { %3578 = vmatprep.subr.msk.bf16.mxu1 %vm493_vm0, %v3648_v28  ;;  %v2163_v28 = vshll.u32 %v4365_v46, 16  ;;  %v2187_v38 = vshll.u32 %v4370_v63, 16  ;;  %v2225_v23 = vshll.u32 %v4389_v60, 16  ;;  %v3150_v34 = vcombine.low %v2132_v39, %v2142_v26 }
  0x82   : > { %v2174_v55 = vor.u32 %v2173_v29, %v2170_v50  ;;  %v4401_v25 = vrot.slane %v2201_v61, 5  ;;  %v2151_v50 = vrot.slane %v2150_v20, 4  ;;  %v2161_v29 = vrot.slane %v2160_v57, 4 }
  0x83   : > { %v2165_v1 = vrot.slane %v2163_v28, 5  ;;  %v2189_v9 = vrot.slane %v2187_v38, 5  ;;  %v2185_v61 = vrot.slane %v2184_v41, 4  ;;  %v2211_v7 = vshll.u32 %v4408_v56, 16  ;;  %v4429_v28 = vld [vmem:[%s3769_s5 + $0x68] sm:$0x1] }
  0x84   : > { %v2175_v2 = vrot.slane %v2174_v55, 4  ;;  %v2218_v35 = vrot.slane %v2216_v4, 4  ;;  %v4419_v59 = vrot.slane %v2225_v23, 5  ;;  %v4421_v57 = vrot.slane %v1363_v11, 5 }
  0x85   : > { %3404 = vmatmul.mubr.msk.bf16.gmra.mrb[12].mxu0 %vm468_vm3, %v3639_v18  ;;  %v2207_v18 = vrot.slane %v2205_v6, 4  ;;  %v2198_v6 = vor.u32 %v2197_v40, %v2194_v44  ;;  %v1369_v53 = vrot.slane %v1367_v48, 4  ;;  %v2156_v52 = vsel %vm3808_vm4, %v2151_v50, %v4358_v15 }
  0x86   : > { %3409 = vmatprep.mubr.msk.bf16.mxu0 %vm468_vm3, %v3148_v54  ;;  %v2229_v54 = vshrl.u32 %v4389_v60, 16  ;;  %v2221_v60 = vrot.slane %v2219_v58, 5  ;;  %v2166_v39 = vsel %vm3808_vm4, %v2161_v29, %v2165_v1  ;;  %v2249_v38 = vshll.u32 %v4417_v12, 16  ;;  %v3640_v1 = vld [vmem:[%s3769_s5 + $0xc] sm:$0xff]  }
  0x87   : > { %3324 = vmatmul.mubr.msk.bf16.gmra.mrb[4].mxu1 %vm468_vm3, %v4666_v22  ;;  %v2208_v22 = vor.u32 %v2207_v18, %v4401_v25  ;;  %v2253_v44 = vshrl.u32 %v4417_v12, 16  ;;  %v4668_v11 = vcombine.low %v4228_v47, %v4246_v51  ;;  %v2180_v15 = vsel %vm3808_vm4, %v2175_v2, %v4367_v49 }
  0x88   : > { %3327 = vmatprep.mubr.msk.bf16.mxu1 %vm468_vm3, %v4667_v33  ;;  %v3144_v33 = vld [vmem:[%s3769_s5 + $0x6c] sm:$0xf]  ;;  %v2231_v20 = vrot.slane %v2229_v54, 4  ;;  %v2190_v41 = vsel %vm3808_vm4, %v2185_v61, %v2189_v9  ;;  %v2199_v40 = vrot.slane %v2198_v6, 4  ;;  %v2213_v18 = vrot.slane %v2211_v7, 5 }
  0x89   : > { %v2240_v26 = vshrl.u32 %v3144_v33, 16  ;;  %v2243_v55 = vshll.u32 %v3144_v33, 16  ;;  %v4669_v4 = vcombine.low %v4267_v62, %v4279_v24  ;;  %v2209_v47 = vrot.slane %v2208_v22, 4  ;;  %v3029_v22 = vld [vmem:[%s3769_s5 + $0x48] sm:$0xf] }
  0x8a   : > { %v2222_v51 = vor.u32 %v2221_v60, %v2218_v35  ;;  %v2235_v49 = vshll.u32 %v4429_v28, 16  ;;  %v1370_v58 = vor.u32 %v1369_v53, %v4421_v57  ;;  %v1373_v23 = vshll.u32 %v4087_v0, 16  ;;  %v4458_v60 = vld [vmem:[%s3769_s5 + $0x74] sm:$0x1] }
  0x8b   : > { %v3151_v54 = vcombine.low %v2156_v52, %v2166_v39  ;;  %v2242_v48 = vrot.slane %v2240_v26, 4  ;;  %v2245_v62 = vrot.slane %v2243_v55, 5  ;;  %v4452_v24 = vrot.slane %v2249_v38, 5 }
  0x8c   : > { %v2255_v50 = vrot.slane %v2253_v44, 4  ;;  %v3152_v29 = vcombine.low %v2180_v15, %v2190_v41  ;;  %v2204_v35 = vsel %vm3808_vm4, %v2199_v40, %v4401_v25  ;;  %v2223_v0 = vrot.slane %v2222_v51, 4  ;;  %v3642_v51 = vld [vmem:[%s3769_s5 + $0x24] sm:$0xff]  }
  0x8d   : > { %3410 = vmatmul.mubr.msk.bf16.vlgmr.msra.gmra.mrb[0].mxu0 %vm468_vm3, %v3149_v13  ;;  %v2214_v13 = vsel %vm3808_vm4, %v2209_v47, %v2213_v18  ;;  %v2237_v2 = vrot.slane %v2235_v49, 5  ;;  %v1371_v9 = vrot.slane %v1370_v58, 4  ;;  %v1375_v61 = vrot.slane %v1373_v23, 5 }
  0x8e   : > { %3426 = vmatpush3.bf16.msra.mxu0 %v2568_v37  ;;  %3413 = vmatprep.mubr.msk.bf16.mxu0 %vm468_vm3, %v3150_v34  ;;  %v2232_v37 = vor.u32 %v2231_v20, %v4419_v59  ;;  %v2463_v6 = vrot.slane %v4216_v31, 5  ;;  %v2246_v7 = vor.u32 %v2245_v62, %v2242_v48  ;;  %v2256_v33 = vor.u32 %v2255_v50, %v4452_v24  ;;  %v3164_v20 = vld [vmem:[%s3769_s5 + $0x18] sm:$0xe]  ;;  %v3166_v62 = vld [vmem:[%s3769_s5 + $0x30] sm:$0xe] }
  0x8f   : > { %3328 = vmatmul.mubr.msk.bf16.gmra.mrb[8].mxu1 %vm468_vm3, %v4668_v11  ;;  %v2259_v25 = vshll.u32 %v4458_v60, 16  ;;  %v4670_v53 = vcombine.low %v4297_v19, %v4309_v10  ;;  %v3153_v52 = vcombine.low %v2204_v35, %v2214_v13  ;;  %v2228_v31 = vsel %vm3808_vm4, %v2223_v0, %v4419_v59  ;;  %v3641_v59 = vld [vmem:[%s3769_s5 + $0x18] sm:$0xff]  }
  0x90   : > { %3331 = vmatprep.mubr.msk.bf16.mxu1 %vm468_vm3, %v4669_v4  ;;  %v2233_v34 = vrot.slane %v2232_v37, 4  ;;  %v1354_v26 = vshrl.u32 %v3029_v22, 16  ;;  %v1357_v55 = vshll.u32 %v3029_v22, 16  ;;  %v3172_v19 = vrot.slane %v3164_v20, 9  ;;  %v3026_v4 = vld [vmem:[%s3769_s5 + $0x3c] sm:$0xf] }
  0x91   : > { %v2465_v10 = vrot.slane %v2463_v6, 4  ;;  %v2466_v38 = vrot.slane %v4250_v30, 5  ;;  %v1376_v44 = vsel %vm3808_vm4, %v1371_v9, %v1375_v61  ;;  %v2247_v11 = vrot.slane %v2246_v7, 4  ;;  %v3165_v30 = vld [vmem:[%s3769_s5 + $0x24] sm:$0xe]  ;;  %v3643_v22 = vld [vmem:[%s3769_s5 + $0x30] sm:$0xff]  }
  0x92   : > { %v2238_v39 = vsel %vm3808_vm4, %v2233_v34, %v2237_v2  ;;  %v2257_v15 = vrot.slane %v2256_v33, 4  ;;  %v2261_v41 = vrot.slane %v2259_v25, 5  ;;  %v1356_v40 = vrot.slane %v1354_v26, 4  ;;  %v3644_v20 = vld [vmem:[%s3769_s5 + $0x3c] sm:$0xff]   ;;  %v3032_v26 = vld [vmem:[%s3769_s5 + $0x54] sm:$0xf] }
  0x93   : > { %v3154_v18 = vcombine.low %v2228_v31, %v2238_v39  ;;  %v1359_v47 = vrot.slane %v1357_v55, 5  ;;  %v2464_v37 = vsel %vm3963_vm7, %v3172_v19, %v2463_v6  ;;  %v2467_v49 = vsel %vm3963_vm7, %v2465_v10, %v2466_v38  ;;  %v3168_v38 = vld [vmem:[%s3769_s5 + $0x48] sm:$0xe] }
  0x94   : > { %v2470_v58 = vrot.slane %v4263_v14, 5  ;;  %v2262_v48 = vsel %vm3808_vm4, %v2257_v15, %v2261_v41  ;;  %v2477_v50 = vrot.slane %v4282_v8, 5  ;;  %v1333_v35 = vshll.u32 %v3026_v4, 16 }
  0x95   : > { %3414 = vmatmul.mubr.msk.bf16.gmra.mrb[4].mxu0 %vm468_vm3, %v3151_v54  ;;  %v1360_v23 = vor.u32 %v1359_v47, %v1356_v40  ;;  %v2252_v54 = vsel %vm3808_vm4, %v2247_v11, %v4452_v24  ;;  %v1339_v14 = vshll.u32 %v4066_v42, 16  ;;  %v3173_v24 = vrot.slane %v3165_v30, 9 }
  0x96   : > { %3417 = vmatprep.mubr.msk.bf16.mxu0 %vm468_vm3, %v3152_v29  ;;  %v1330_v29 = vshrl.u32 %v3026_v4, 16  ;;  %v2473_v8 = vrot.slane %v4305_v36, 5  ;;  %v3181_v0 = vcombine.low %v2464_v37, %v2467_v49  ;;  %v2472_v34 = vrot.slane %v2470_v58, 4  ;;  %v3645_v37 = vld [vmem:[%s3769_s5 + $0x48] sm:$0xff]  }
  0x97   : > { %3332 = vmatmul.mubr.msk.bf16.gmra.mrb[12].mxu1 %vm468_vm3, %v4670_v53  ;;  %v1361_v13 = vrot.slane %v1360_v23, 4  ;;  %v3174_v2 = vrot.slane %v3166_v62, 9  ;;  %v3155_v61 = vcombine.low %v2252_v54, %v2262_v48  ;;  %v2479_v6 = vrot.slane %v2477_v50, 4  ;;  %v3646_v23 = vld [vmem:[%s3769_s5 + $0x54] sm:$0xff]  }
  0x98   : > { %3337 = vmatprep.mubr.msk.bf16.mxu1 %vm468_vm3, %v3640_v1  ;;  %v1343_v1 = vshrl.u32 %v4066_v42, 16  ;;  %v2480_v42 = vrot.slane %v4312_v21, 5  ;;  %v1332_v7 = vrot.slane %v1330_v29, 4  ;;  %v1335_v33 = vrot.slane %v1333_v35, 5 }
  0x99   : > { %v1366_v9 = vsel %vm3808_vm4, %v1361_v13, %v4421_v57  ;;  %v4514_v25 = vrot.slane %v1339_v14, 5  ;;  %v2471_v53 = vsel %vm3963_vm7, %v3173_v24, %v2470_v58  ;;  %v2474_v57 = vsel %vm3963_vm7, %v2472_v34, %v2473_v8  ;;  %v3169_v24 = vld [vmem:[%s3769_s5 + $0x54] sm:$0xe]  ;;  %v4671_v8 = vld [vmem:[#allocation5_spill] sm:$0xff] }
  0x9a   : > { %v1345_v36 = vrot.slane %v1343_v1, 4  ;;  %v2478_v21 = vsel %vm3963_vm7, %v3174_v2, %v2477_v50  ;;  %v2484_v31 = vrot.slane %v4323_v43, 5  ;;  %v1349_v39 = vshll.u32 %v4069_v45, 16  ;;  %v3035_v50 = vld [vmem:[%s3769_s5 + $0x60] sm:$0xf] }
  0x9b   : > { %v2481_v55 = vsel %vm3963_vm7, %v2479_v6, %v2480_v42  ;;  %v1336_v19 = vor.u32 %v1335_v33, %v1332_v7  ;;  %v3182_v43 = vcombine.low %v2471_v53, %v2474_v57  ;;  %v2487_v11 = vrot.slane %v4365_v46, 5  ;;  %v4673_v33 = vld [vmem:[#allocation2_spill] sm:$0xff] }
  0x9c   : > { %v1346_v10 = vor.u32 %v1345_v36, %v4514_v25  ;;  %v1378_v15 = vshrl.u32 %v3032_v26, 16  ;;  %v1381_v41 = vshll.u32 %v3032_v26, 16  ;;  %v1387_v40 = vshll.u32 %v4095_v17, 16 }
  0x9d   : > { %3418 = vmatmul.mubr.msk.bf16.gmra.mrb[8].mxu0 %vm468_vm3, %v3153_v52  ;;  %v3167_v52 = vld [vmem:[%s3769_s5 + $0x3c] sm:$0xe]  ;;  %v2486_v4 = vrot.slane %v2484_v31, 4  ;;  %v1351_v47 = vrot.slane %v1349_v39, 5  ;;  %v2494_v58 = vrot.slane %v4370_v63, 5  ;;  %v2498_v63 = vrot.slane %v4355_v27, 5 }
  0x9e   : > { %3421 = vmatprep.mubr.msk.bf16.mxu0 %vm468_vm3, %v3154_v18  ;;  %v3175_v45 = vrot.slane %v3167_v52, 9  ;;  %v3183_v18 = vcombine.low %v2478_v21, %v2481_v55  ;;  %v1347_v49 = vrot.slane %v1346_v10, 4  ;;  %v1380_v46 = vrot.slane %v1378_v15, 4  ;;  %v3170_v27 = vld [vmem:[%s3769_s5 + $0x60] sm:$0xe] }
  0x9f   : > { %3338 = vmatmul.mubr.msk.bf16.vlgmr.msra.gmra.mrb[0].mxu1 %vm468_vm3, %v3641_v59  ;;  %v1391_v59 = vshrl.u32 %v4095_v17, 16  ;;  %v1383_v54 = vrot.slane %v1381_v41, 5  ;;  %v1389_v48 = vrot.slane %v1387_v40, 5  ;;  %v2488_v29 = vsel %vm3963_vm7, %v2486_v4, %v2487_v11  ;;  %v3647_v52 = vld [vmem:[%s3769_s5 + $0x60] sm:$0xff]  }
  0xa0   : > { %3444 = vmatpush3.bf16.msra.mxu1 %v3751_v3  ;;  %3341 = vmatprep.mubr.msk.bf16.mxu1 %vm468_vm3, %v3642_v51  ;;  %v4511_v3 = vcombine.low %v1366_v9, %v1376_v44  ;;  %v2491_v44 = vrot.slane %v4334_v16, 5  ;;  %v3176_v51 = vrot.slane %v3168_v38, 9  ;;  %v1337_v16 = vrot.slane %v1336_v19, 4  ;;  %v4672_v9 = vld [vmem:[#allocation3_spill] sm:$0xff] }
  0xa1   : > { %v1393_v62 = vrot.slane %v1391_v59, 4  ;;  %v2485_v17 = vsel %vm3963_vm7, %v3175_v45, %v2484_v31  ;;  %v1352_v1 = vsel %vm3808_vm4, %v1347_v49, %v1351_v47  ;;  %v1402_v34 = vshrl.u32 %v3035_v50, 16  ;;  %v3171_v47 = vld [vmem:[%s3769_s5 + $0x6c] sm:$0xe]  ;;  %s4610_s5 = scalar_lea.vmem %s4651_s2, %s2915_s29 }
  0xa2   : > { %v2493_v30 = vrot.slane %v2491_v44, 4  ;;  %v2492_v35 = vsel %vm3963_vm7, %v3176_v51, %v2491_v44  ;;  %v1342_v14 = vsel %vm3808_vm4, %v1337_v16, %v4514_v25  ;;  %v1405_v2 = vshll.u32 %v3035_v50, 16 }
  0xa3   : > { %v1415_v6 = vshrl.u32 %v4672_v9, 16  ;;  %v3184_v42 = vcombine.low %v2485_v17, %v2488_v29  ;;  %v1394_v7 = vor.u32 %v1393_v62, %v1389_v48  ;;  %v1397_v25 = vshll.u32 %v4673_v33, 16 }
  0xa4   : > { %v2495_v13 = vsel %vm3963_vm7, %v2493_v30, %v2494_v58  ;;  %v2500_v53 = vrot.slane %v2498_v63, 4  ;;  %v2501_v57 = vrot.slane %v4408_v56, 5  ;;  %v3043_v21 = vcombine.low %v1342_v14, %v1352_v1 }
  0xa5   : > { %3422 = vmatmul.mubr.msk.bf16.gmra.mrb[12].mxu0 %vm468_vm3, %v3155_v61  ;;  %v1411_v61 = vshll.u32 %v4672_v9, 16  ;;  %v3185_v36 = vcombine.low %v2492_v35, %v2495_v13  ;;  %v3178_v31 = vrot.slane %v3170_v27, 9  ;;  %v2508_v26 = vrot.slane %v4429_v28, 5 }
  0xa6   : > { %3427 = vmatprep.mubr.msk.bf16.mxu0 %vm468_vm3, %v3181_v0  ;;  %v2505_v0 = vrot.slane %v4671_v8, 5  ;;  %v1404_v55 = vrot.slane %v1402_v34, 4  ;;  %v1407_v19 = vrot.slane %v1405_v2, 5  ;;  %v1417_v38 = vrot.slane %v1415_v6, 4 }
  0xa7   : > { %3342 = vmatmul.mubr.msk.bf16.gmra.mrb[4].mxu1 %vm468_vm3, %v3643_v22  ;;  %v1384_v22 = vor.u32 %v1383_v54, %v1380_v46  ;;  %v1413_v10 = vrot.slane %v1411_v61, 5  ;;  %v1399_v45 = vrot.slane %v1397_v25, 5  ;;  %v2502_v28 = vsel %vm3963_vm7, %v2500_v53, %v2501_v57 }
  0xa8   : > { %3345 = vmatprep.mubr.msk.bf16.mxu1 %vm468_vm3, %v3644_v20  ;;  %v3177_v20 = vrot.slane %v3169_v24, 9  ;;  %v2507_v39 = vrot.slane %v2505_v0, 4  ;;  %v2506_v11 = vsel %vm3963_vm7, %v3178_v31, %v2505_v0  ;;  %v2512_v15 = vrot.slane %v4417_v12, 5 }
  0xa9   : > { %v1385_v44 = vrot.slane %v1384_v22, 4  ;;  %v1408_v40 = vor.u32 %v1407_v19, %v1404_v55  ;;  %v1418_v59 = vor.u32 %v1417_v38, %v1413_v10  ;;  %v3179_v30 = vrot.slane %v3171_v47, 9 }
  0xaa   : > { %v2499_v56 = vsel %vm3963_vm7, %v3177_v20, %v2498_v63  ;;  %v2509_v41 = vsel %vm3963_vm7, %v2507_v39, %v2508_v26  ;;  %v2514_v12 = vrot.slane %v2512_v15, 4  ;;  %v2515_v58 = vrot.slane %v4458_v60, 5 }
  0xab   : > { %v1390_v51 = vsel %vm3808_vm4, %v1385_v44, %v1389_v48  ;;  %v3186_v16 = vcombine.low %v2499_v56, %v2502_v28  ;;  %v3187_v49 = vcombine.low %v2506_v11, %v2509_v41  ;;  %v1409_v46 = vrot.slane %v1408_v40, 4 }
  0xac   : > { %v1419_v54 = vrot.slane %v1418_v59, 4  ;;  %v2513_v48 = vsel %vm3963_vm7, %v3179_v30, %v2512_v15  ;;  %v2516_v50 = vsel %vm3963_vm7, %v2514_v12, %v2515_v58 }
  0xad   : > { %3428 = vmatmul.mubr.msk.bf16.vlgmr.msra.gmra.mrb[0].mxu0 %vm468_vm3, %v3182_v43  ;;  %v1395_v43 = vrot.slane %v1394_v7, 4  ;;  %v1414_v60 = vsel %vm3808_vm4, %v1409_v46, %v1413_v10  ;;  %v3188_v29 = vcombine.low %v2513_v48, %v2516_v50 }
  0xae   : > { %3431 = vmatprep.mubr.msk.bf16.mxu0 %vm468_vm3, %v3183_v18  ;;  %v4674_v18 = vld [vmem:[#allocation4_spill] sm:$0xff] }
  0xaf   : > { %3346 = vmatmul.mubr.msk.bf16.gmra.mrb[8].mxu1 %vm468_vm3, %v3645_v37  ;;  %v1421_v4 = vshll.u32 %v4674_v18, 16  ;;  %v1400_v37 = vsel %vm3808_vm4, %v1395_v43, %v1399_v45 }
  0xb0   : > { %3349 = vmatprep.mubr.msk.bf16.mxu1 %vm468_vm3, %v3646_v23  ;;  %v3045_v23 = vcombine.low %v1390_v51, %v1400_v37 }
  0xb1   : > { %v1423_v62 = vrot.slane %v1421_v4, 5 }
  0xb3   : > { %v1424_v17 = vsel %vm3808_vm4, %v1419_v54, %v1423_v62 }
  0xb4   : > { %v3046_v35 = vcombine.low %v1414_v60, %v1424_v17 }
  0xb5   : > { %3432 = vmatmul.mubr.msk.bf16.gmra.mrb[4].mxu0 %vm468_vm3, %v3184_v42 }
  0xb6   : > { %3435 = vmatprep.mubr.msk.bf16.mxu0 %vm468_vm3, %v3185_v36 }
  0xb7   : > { %3350 = vmatmul.mubr.msk.bf16.gmra.mrb[12].mxu1 %vm468_vm3, %v3647_v52 }
  0xb8   : > { %3363 = vmatprep.mubr.msk.bf16.mxu1 %vm468_vm3, %v3043_v21 }
  0xbd   : > { %3436 = vmatmul.mubr.msk.bf16.gmra.mrb[8].mxu0 %vm468_vm3, %v3186_v16 }
  0xbe   : > { %3439 = vmatprep.mubr.msk.bf16.mxu0 %vm468_vm3, %v3187_v49 }
  0xbf   : > { %3364 = vmatmul.mubr.msk.bf16.vlgmr.msra.gmra.mrb[8].mxu1 %vm468_vm3, %v4511_v3 }
  0xc0   : > { %3367 = vmatprep.mubr.msk.bf16.mxu1 %vm468_vm3, %v3045_v23 }
  0xc5   : > { %3440 = vmatmul.mubr.msk.bf16.gmra.mrb[12].mxu0 %vm468_vm3, %v3188_v29 }
  0xc7   : > { %3368 = vmatmul.mubr.msk.bf16.gmra.mrb[12].mxu1 %vm468_vm3, %v3046_v35 }
 0x172   : > { %v3339_v3 = vpop.f32.mrb[0].mxu1 }
 0x173   : > { %v1130_v5 = vpop.f32.mrb[1].mxu1 }
 0x174   : > { %v3340_v63 = vpop.f32.mrb[2].mxu1 }
 0x175   : > { %v1133_v14 = vpop.f32.mrb[3].mxu1 }
 0x17a   : > { %v3343_v1 = vpop.f32.mrb[4].mxu1 }
 0x17b   : > { %v1146_v13 = vpop.f32.mrb[5].mxu1 }
 0x17c   : > { %v3344_v32 = vpop.f32.mrb[6].mxu1 }
 0x17d   : > { %v1149_v24 = vpop.f32.mrb[7].mxu1 }
 0x180   : > { %v3429_v8 = vpop.f32.mrb[0].mxu0 }
 0x181   : > { %v3445_v0 = vadd.f32 %v3429_v8, %v3339_v3  ;;  %v2604_v27 = vpop.f32.mrb[1].mxu0 }
 0x182   : > { %v3446_v34 = vadd.f32 %v2604_v27, %v1130_v5  ;;  %v3430_v2 = vpop.f32.mrb[2].mxu0 }
 0x183   : > { %2685 = vst [vmem:[%s4610_s5 + $0x10] sm:$0xff] %v3445_v0  ;;  %v3447_v9 = vadd.f32 %v3430_v2, %v3340_v63  ;;  %v2607_v61 = vpop.f32.mrb[3].mxu0  ;;  %v2723_v33 = vmul.f32 %v3445_v0, %v3445_v0 }
 0x184   : > { %2683 = vst [vmem:[%s4610_s5] sm:$0xff] %v3446_v34  ;;  %v3448_v6 = vadd.f32 %v2607_v61, %v1133_v14  ;;  %v2721_v42 = vmul.f32 %v3446_v34, %v3446_v34 }
 0x185   : > { %2686 = vst [vmem:[%s4610_s5 + $0x18] sm:$0xff] %v3447_v9  ;;  %v2724_v52 = vmul.f32 %v3447_v9, %v3447_v9 }
 0x186   : > { %2684 = vst [vmem:[%s4610_s5 + $0x8] sm:$0xff] %v3448_v6  ;;  %v2699_v22 = vadd.f32 %v3448_v6, %v3446_v34  ;;  %v2722_v7 = vmul.f32 %v3448_v6, %v3448_v6 }
 0x188   : > { %v2700_v25 = vadd.f32 %v3445_v0, %v2699_v22  ;;  %v2737_v36 = vadd.f32 %v2722_v7, %v2721_v42  ;;  %v3433_v20 = vpop.f32.mrb[4].mxu0 }
 0x189   : > { %v3449_v53 = vadd.f32 %v3433_v20, %v3343_v1  ;;  %v2620_v57 = vpop.f32.mrb[5].mxu0 }
 0x18a   : > { %v2738_v21 = vadd.f32 %v2737_v36, %v2723_v33  ;;  %v3450_v31 = vadd.f32 %v2620_v57, %v1146_v13  ;;  %v2701_v39 = vadd.f32 %v3447_v9, %v2700_v25  ;;  %v3434_v26 = vpop.f32.mrb[6].mxu0 }
 0x18b   : > { %2689 = vst [vmem:[%s4610_s5 + $0x30] sm:$0xff] %v3449_v53  ;;  %v3451_v55 = vadd.f32 %v3434_v26, %v3344_v32  ;;  %v2623_v19 = vpop.f32.mrb[7].mxu0  ;;  %v2727_v11 = vmul.f32 %v3449_v53, %v3449_v53 }
 0x18c   : > { %2687 = vst [vmem:[%s4610_s5 + $0x20] sm:$0xff] %v3450_v31  ;;  %v2702_v10 = vadd.f32 %v3450_v31, %v2701_v39  ;;  %v2725_v38 = vmul.f32 %v3450_v31, %v3450_v31  ;;  %v2739_v44 = vadd.f32 %v2738_v21, %v2724_v52  ;;  %v3452_v43 = vadd.f32 %v2623_v19, %v1149_v24 }
 0x18d   : > { %2690 = vst [vmem:[%s4610_s5 + $0x38] sm:$0xff] %v3451_v55  ;;  %v2728_v4 = vmul.f32 %v3451_v55, %v3451_v55 }
 0x18e   : > { %v2740_v45 = vadd.f32 %v2739_v44, %v2725_v38  ;;  %2688 = vst [vmem:[%s4610_s5 + $0x28] sm:$0xff] %v3452_v43  ;;  %v2703_v56 = vadd.f32 %v3452_v43, %v2702_v10  ;;  %v2726_v28 = vmul.f32 %v3452_v43, %v3452_v43 }
 0x190   : > { %v2704_v15 = vadd.f32 %v3449_v53, %v2703_v56  ;;  %v2741_v41 = vadd.f32 %v2740_v45, %v2726_v28  ;;  %v3437_v40 = vpop.f32.mrb[8].mxu0 }
 0x191   : > { %v2636_v18 = vpop.f32.mrb[9].mxu0 }
 0x192   : > { %v3365_v59 = vpop.f32.mrb[8].mxu1  ;;  %v2742_v47 = vadd.f32 %v2741_v41, %v2727_v11  ;;  %v2705_v16 = vadd.f32 %v3451_v55, %v2704_v15  ;;  %v3438_v49 = vpop.f32.mrb[10].mxu0 }
 0x193   : > { %v3453_v51 = vadd.f32 %v3437_v40, %v3365_v59  ;;  %v1544_v37 = vpop.f32.mrb[9].mxu1  ;;  %v2639_v58 = vpop.f32.mrb[11].mxu0 }
 0x194   : > { %v3454_v30 = vadd.f32 %v2636_v18, %v1544_v37  ;;  %v3366_v12 = vpop.f32.mrb[10].mxu1  ;;  %v2743_v23 = vadd.f32 %v2742_v47, %v2728_v4 }
 0x195   : > { %2693 = vst [vmem:[%s4610_s5 + $0x50] sm:$0xff] %v3453_v51  ;;  %v3455_v46 = vadd.f32 %v3438_v49, %v3366_v12  ;;  %v1547_v54 = vpop.f32.mrb[11].mxu1  ;;  %v2731_v3 = vmul.f32 %v3453_v51, %v3453_v51 }
 0x196   : > { %2691 = vst [vmem:[%s4610_s5 + $0x40] sm:$0xff] %v3454_v30  ;;  %v2706_v62 = vadd.f32 %v3454_v30, %v2705_v16  ;;  %v2729_v48 = vmul.f32 %v3454_v30, %v3454_v30  ;;  %v3456_v50 = vadd.f32 %v2639_v58, %v1547_v54 }
 0x197   : > { %2694 = vst [vmem:[%s4610_s5 + $0x58] sm:$0xff] %v3455_v46  ;;  %v2732_v8 = vmul.f32 %v3455_v46, %v3455_v46 }
 0x198   : > { %v2744_v60 = vadd.f32 %v2743_v23, %v2729_v48  ;;  %2692 = vst [vmem:[%s4610_s5 + $0x48] sm:$0xff] %v3456_v50  ;;  %v2707_v17 = vadd.f32 %v3456_v50, %v2706_v62  ;;  %v2730_v29 = vmul.f32 %v3456_v50, %v3456_v50  ;;  %v3441_v35 = vpop.f32.mrb[12].mxu0 }
 0x199   : > { %v2652_v1 = vpop.f32.mrb[13].mxu0 }
 0x19a   : > { %v2708_v5 = vadd.f32 %v3453_v51, %v2707_v17  ;;  %v2745_v63 = vadd.f32 %v2744_v60, %v2730_v29  ;;  %v3369_v14 = vpop.f32.mrb[12].mxu1  ;;  %v3442_v24 = vpop.f32.mrb[14].mxu0 }
 0x19b   : > { %v3457_v13 = vadd.f32 %v3441_v35, %v3369_v14  ;;  %v1560_v32 = vpop.f32.mrb[13].mxu1  ;;  %v2655_v9 = vpop.f32.mrb[15].mxu0 }
 0x19c   : > { %v2746_v0 = vadd.f32 %v2745_v63, %v2731_v3  ;;  %v3458_v27 = vadd.f32 %v2652_v1, %v1560_v32  ;;  %v2709_v34 = vadd.f32 %v3455_v46, %v2708_v5  ;;  %v3370_v2 = vpop.f32.mrb[14].mxu1 }
 0x19d   : > { %2697 = vst [vmem:[%s4610_s5 + $0x70] sm:$0xff] %v3457_v13  ;;  %v3459_v61 = vadd.f32 %v3442_v24, %v3370_v2  ;;  %v1563_v6 = vpop.f32.mrb[15].mxu1  ;;  %v2735_v53 = vmul.f32 %v3457_v13, %v3457_v13 }
 0x19e   : > { %2695 = vst [vmem:[%s4610_s5 + $0x60] sm:$0xff] %v3458_v27  ;;  %v2710_v42 = vadd.f32 %v3458_v27, %v2709_v34  ;;  %v2733_v22 = vmul.f32 %v3458_v27, %v3458_v27  ;;  %v2747_v7 = vadd.f32 %v2746_v0, %v2732_v8  ;;  %v3460_v33 = vadd.f32 %v2655_v9, %v1563_v6 }
 0x19f   : > { %2698 = vst [vmem:[%s4610_s5 + $0x78] sm:$0xff] %v3459_v61  ;;  %v2736_v21 = vmul.f32 %v3459_v61, %v3459_v61 }
 0x1a0   : > { %v2748_v25 = vadd.f32 %v2747_v7, %v2733_v22  ;;  %2696 = vst [vmem:[%s4610_s5 + $0x68] sm:$0xff] %v3460_v33  ;;  %v2711_v36 = vadd.f32 %v3460_v33, %v2710_v42  ;;  %v2734_v20 = vmul.f32 %v3460_v33, %v3460_v33 }
 0x1a2   : > { %v2712_v57 = vadd.f32 %v3457_v13, %v2711_v36  ;;  %v2749_v52 = vadd.f32 %v2748_v25, %v2734_v20 }
 0x1a4   : > { %v2713_v31 = vadd.f32 %v3459_v61, %v2712_v57  ;;  %v2750_v39 = vadd.f32 %v2749_v52, %v2735_v53 }
 0x1a6   : > { %v2714_v26 = vrot.slane %v2713_v31, 4  ;;  %v2751_v55 = vadd.f32 %v2750_v39, %v2736_v21 }
 0x1a8   : > { %v2715_v19 = vadd.f32 %v2714_v26, %v2713_v31  ;;  %v2752_v10 = vrot.slane %v2751_v55, 4 }
 0x1aa   : > { %v2716_v38 = vrot.slane %v2715_v19, 2  ;;  %v2753_v44 = vadd.f32 %v2752_v10, %v2751_v55 }
 0x1ac   : > { %v2717_v43 = vadd.f32 %v2716_v38, %v2715_v19  ;;  %v2754_v45 = vrot.slane %v2753_v44, 2 }
 0x1ae   : > { %v2718_v56 = vrot.slane %v2717_v43, 1  ;;  %v2755_v28 = vadd.f32 %v2754_v45, %v2753_v44 }
 0x1b0   : > { %v2719_v11 = vadd.f32 %v2718_v56, %v2717_v43  ;;  %v2756_v15 = vrot.slane %v2755_v28, 1 }
 0x1b2   : > { %2720 = vst [vmem:[%s216_s11] sm:$0x1] %v2719_v11  ;;  %v2757_v41 = vadd.f32 %v2756_v15, %v2755_v28 }
 0x1b4   : > { %2758 = vst [vmem:[%s216_s11 + $0x1] sm:$0x1] %v2757_v41 }
 0x1b5 PF: > { %s14_s16 = sadd.s32 1, %s3687_s16   ;;  %s4675_s12 = smov %s3679_s14 }
 0x1b6   : > { %p11_p8 = scmp.ge.s32.totalorder %s14_s16, 6   ;;  %s4676_s13 = smov %s3683_s15 }
 0x1b7   : > { %s4677_s14 = smov %s4680_s17  ;;  %s4678_s15 = smov %s4684_s18 }
 0x1b8   :  { %13 = sbr.rel (!%p11_p8) target bundleno = 3 (0x3), region = 81 }

</bundles_post_ra>
